<compile_context>
chip_gen: v7x
topology: tpu7x:2x2x1
jax: 0.10.0
libtpu: 0.0.40
codegen_flags: <defaults>
</compile_context>

<pallas_src>
import functools

import jax
import jax.numpy as jnp
from jax.experimental import pallas as pl
from jax.experimental.pallas import tpu as pltpu

GROUPS = 32
EPS = 1e-5
_HI = jax.lax.Precision.HIGHEST


def _group_sum(col, gs):
    """Exact f32 per-group sum of a (C, k) per-channel column, replicated back
    to every channel of its group (groups = contiguous blocks of `gs` channels).

    Uses sublane rolls (XLU) + boundary masks instead of a (C, C) membership
    matmul, so there is no extra kernel input and no MXU precision concern.
    Identity when gs == 1 (e.g. GroupNorm(32, 32))."""
    if gs == 1:
        return col
    C = col.shape[0]
    off = jax.lax.broadcasted_iota(jnp.int32, (C, 1), 0) % gs   # channel offset in group
    out = col
    for d in range(1, gs):
        up = pltpu.roll(col, C - d, axis=0)   # up[i] = col[i + d]   (wrap masked off)
        dn = pltpu.roll(col, d, axis=0)       # dn[i] = col[i - d]
        out = out + jnp.where(off < gs - d, up, 0.0) + jnp.where(off >= d, dn, 0.0)
    return out


def _conv1d_k3(h, w_stacked, bias, first_mask, last_mask):
    """Conv1d(kernel=3, padding=1) on h:(C_in, L2) in f32.

    w_stacked:(C_out, 3*C_in) = [tap(l-1) | tap(l) | tap(l+1)] along the input
    channel axis.  Shifted inputs come from pltpu.roll (XLU) with hoisted
    (1, L2) edge masks for the zero padding; each slab is cast to bf16 BEFORE
    the sublane concat so no (3C, L2) f32 temporary is materialized.  Single
    bf16 MXU matmul with f32 accumulation."""
    L2 = h.shape[1]
    h_prev = jnp.where(first_mask, 0.0, pltpu.roll(h, 1, axis=1)).astype(jnp.bfloat16)
    h_mid = h.astype(jnp.bfloat16)
    h_next = jnp.where(last_mask, 0.0, pltpu.roll(h, L2 - 1, axis=1)).astype(jnp.bfloat16)
    h_stack = jnp.concatenate([h_prev, h_mid, h_next], axis=0)   # (3C, L2) bf16
    y = jnp.dot(w_stacked, h_stack, preferred_element_type=jnp.float32)
    return y + bias


def _audio_downsample_kernel(x_ref, tmod_ref, colp_ref, w1_ref, w2_ref, o_ref,
                             *, factor, bt):
    # x_ref   : (bt, factor, C, L2) bf16 — phase p holds x[:, :, p::factor]
    # tmod_ref: (bt, C, 2)          f32 — per-batch FiLM (1 + t_1, t_2)
    # colp_ref: (C, 6)              f32 — packed g1, be1, b1, g2, be2, b2
    # w1/w2   : (C, 3C)            bf16 — stacked 3-tap conv weights
    C, L2 = o_ref.shape[1], o_ref.shape[2]
    gs = C // GROUPS
    inv_f = 1.0 / float(factor)
    cnt1 = float(gs * L2 * factor)
    cnt2 = float(gs * L2)

    # Constants hoisted once per kernel invocation (shared by all bt batches).
    colp = colp_ref[...]
    g1, be1, b1 = colp[:, 0:1], colp[:, 1:2], colp[:, 2:3]
    g2, be2, b2 = colp[:, 3:4], colp[:, 4:5], colp[:, 5:6]
    w1 = w1_ref[...]
    w2 = w2_ref[...]
    lane = jax.lax.broadcasted_iota(jnp.int32, (1, L2), 1)
    first_mask = lane == 0
    last_mask = lane == (L2 - 1)

    for b in range(bt):
        tm = tmod_ref[b]
        t1 = tm[:, 0:1]                  # (1 + t_1)
        t2 = tm[:, 1:2]                  # t_2

        # ---- GroupNorm_1 stats (two-pass) + avg-pool of the skip path -------
        s = jnp.zeros((C, 1), jnp.float32)
        skip = jnp.zeros((C, L2), jnp.float32)
        for p in range(factor):
            xp = x_ref[b, p].astype(jnp.float32)
            s = s + jnp.sum(xp, axis=1, keepdims=True)
            skip = skip + xp
        skip = skip * inv_f                                   # avg_pool1d(x_skip)
        mean1 = _group_sum(s, gs) / cnt1

        v = jnp.zeros((C, 1), jnp.float32)
        for p in range(factor):                               # re-read, no live list
            d = x_ref[b, p].astype(jnp.float32) - mean1
            v = v + jnp.sum(d * d, axis=1, keepdims=True)
        inv1 = jax.lax.rsqrt(_group_sum(v, gs) / cnt1 + EPS)

        # ---- normalize -> SiLU -> avg-pool -----------------------------------
        scale1 = inv1 * g1
        pooled = jnp.zeros((C, L2), jnp.float32)
        for p in range(factor):
            xp = x_ref[b, p].astype(jnp.float32)
            pooled = pooled + jax.nn.silu((xp - mean1) * scale1 + be1)
        pooled = pooled * inv_f                               # avg_pool1d(silu(gn_1(x)))

        # ---- f_1 conv -> GroupNorm_2 -> FiLM -> f_2 conv -> residual ---------
        f1 = _conv1d_k3(pooled, w1, b1, first_mask, last_mask)
        mean2 = _group_sum(jnp.sum(f1, axis=1, keepdims=True), gs) / cnt2
        d2 = f1 - mean2
        var2 = _group_sum(jnp.sum(d2 * d2, axis=1, keepdims=True), gs) / cnt2
        gn2 = d2 * (jax.lax.rsqrt(var2 + EPS) * g2) + be2
        mod = jax.nn.silu(t2 + t1 * gn2)
        f2 = _conv1d_k3(mod, w2, b2, first_mask, last_mask)

        o_ref[b] = (f2 + skip).astype(o_ref.dtype)


def _pick_batch_tile(B, per_batch_bytes, target_bytes=512 * 1024):
    """Largest divisor of B whose input block stays under target_bytes while
    keeping >=2 grid steps whenever B >= 2 (v7x megacore)."""
    best = 1
    for d in range(1, B + 1):
        if B % d:
            continue
        if B >= 2 and B // d < 2:
            continue
        if d * per_batch_bytes <= target_bytes:
            best = d
    return best


def audio_downsample(x, t, params, downsample_factor=2, in_dtype=jnp.bfloat16):
    B, C, L = x.shape
    f = downsample_factor
    assert C % GROUPS == 0 and L % f == 0
    L2 = L // f

    # Time-embedding projection once outside the kernel (tiny GEMM, no reuse).
    tproj = jnp.dot(jax.nn.silu(t), params["Wt"].T, precision=_HI) + params["bt"]
    t1 = tproj[:, :C] + 1.0
    t2 = tproj[:, C:]
    tmod = jnp.stack([t1, t2], axis=-1).astype(jnp.float32)          # (B, C, 2)

    # Per-channel affine / bias columns packed into one lane-padded input.
    colp = jnp.stack([params["g1"], params["be1"], params["b1"],
                      params["g2"], params["be2"], params["b2"]],
                     axis=1).astype(jnp.float32)                     # (C, 6)

    # Conv weights (C_out, C_in, 3) -> stacked (C_out, 3*C_in) bf16 operands.
    def stack_w(W):
        return jnp.transpose(W, (0, 2, 1)).reshape(C, 3 * C).astype(jnp.bfloat16)
    w1s = stack_w(params["W1"])
    w2s = stack_w(params["W2"])

    # Deinterleave L into `factor` phases; the bf16 cast is fused into the same
    # copy so the one extra HBM pass runs at half width.
    # TODO(synk): fuse this deinterleave into the producer of x when integrating
    # into the full UNet so the extra HBM pass disappears entirely.
    x_ph = x.reshape(B, C, L2, f).transpose(0, 3, 1, 2).astype(in_dtype)  # (B,f,C,L2)

    in_item = jnp.dtype(in_dtype).itemsize
    out_item = x.dtype.itemsize
    bt = _pick_batch_tile(B, f * C * L2 * in_item)

    # VMEM budget: double-buffered blocks + constants + the f32 in-kernel
    # working set (skip/pooled/f1/gn2/mod/f2 + conv slabs), generation-aware cap.
    est = (2 * bt * f * C * L2 * in_item        # x block (double-buffered)
           + 2 * bt * C * L2 * out_item         # output block
           + 2 * bt * C * 128 * 4               # FiLM columns (lane padded)
           + 2 * C * 128 * 4                    # packed affine columns
           + 2 * 2 * (C * 3 * C * 2)            # two bf16 conv weight stacks
           + 10 * C * L2 * 4)                   # live f32 (C, L2) values
    try:
        cap = pltpu.get_tpu_info().vmem_capacity_bytes
    except Exception:
        cap = 64 << 20                           # conservative (v7x-sized) fallback
    vmem_limit = int(min(max(2 * est, 16 << 20), (3 * cap) // 4))

    kernel = functools.partial(_audio_downsample_kernel, factor=f, bt=bt)

    # TODO(synk): for very long sequences where the (C, L2) f32 working set no
    # longer fits v7x's 64 MiB VMEM, add an L-tiled grid axis with a two-pass
    # GroupNorm (stats pass, then normalize/conv pass); it also gives a second
    # parallel axis when B == 1.
    def _build(const_mode):
        def _const(shape):
            if const_mode is None:
                return pl.BlockSpec(shape, lambda i: (0,) * len(shape))
            return pl.BlockSpec(shape, lambda i: (0,) * len(shape),
                                pipeline_mode=const_mode)

        grid_spec = pltpu.PrefetchScalarGridSpec(
            num_scalar_prefetch=0,
            grid=(B // bt,),
            in_specs=[
                pl.BlockSpec((bt, f, C, L2), lambda i: (i, 0, 0, 0)),  # x phases
                pl.BlockSpec((bt, C, 2), lambda i: (i, 0, 0)),         # FiLM t1/t2
                _const((C, 6)),                                        # affine cols
                _const((C, 3 * C)),                                    # conv1 weights
                _const((C, 3 * C)),                                    # conv2 weights
            ],
            out_specs=pl.BlockSpec((bt, C, L2), lambda i: (i, 0, 0)),
        )
        return pl.pallas_call(
            kernel,
            out_shape=jax.ShapeDtypeStruct((B, C, L2), x.dtype),
            grid_spec=grid_spec,
            compiler_params=pltpu.CompilerParams(
                dimension_semantics=("parallel",),
                vmem_limit_bytes=vmem_limit),
        )(x_ph, tmod, colp, w1s, w2s)

    try:
        # Never-refetched constants: request single buffering (frees VMEM, v7x).
        return _build(pl.Buffered(1))
    except Exception:
        # This Pallas build rejects pipeline_mode / single buffering; use default.
        return _build(None)


# ---------------- pure-JAX reference (mirrors the PyTorch forward) ----------------
def ref_forward(x, t, p, factor=2):
    silu = jax.nn.silu
    C = x.shape[1]
    tp = jnp.dot(silu(t), p["Wt"].T, precision=_HI) + p["bt"]      # (B, 2C)
    t1 = tp[:, :C][:, :, None] + 1.0
    t2 = tp[:, C:][:, :, None]

    def gn(h, gamma, beta):
        B_, C_, L_ = h.shape
        hr = h.reshape(B_, GROUPS, -1)
        mu = hr.mean(-1, keepdims=True)
        var = hr.var(-1, keepdims=True)
        hn = ((hr - mu) / jnp.sqrt(var + EPS)).reshape(B_, C_, L_)
        return hn * gamma[None, :, None] + beta[None, :, None]

    def pool(h):
        B_, C_, L_ = h.shape
        return h.reshape(B_, C_, L_ // factor, factor).mean(-1)

    def conv(h, W, b):
        out = jax.lax.conv_general_dilated(
            h, W, (1,), [(1, 1)],
            dimension_numbers=("NCH", "OIH", "NCH"), precision=_HI)
        return out + b[None, :, None]

    g = silu(gn(x, p["g1"], p["be1"]))
    f1 = conv(pool(g), p["W1"], p["b1"])
    g2 = gn(f1, p["g2"], p["be2"])
    f2 = conv(silu(t2 + t1 * g2), p["W2"], p["b2"])
    return f2 + pool(x)


if __name__ == "__main__":
    # C must be a multiple of 32 for GroupNorm(32, C); L chosen so L2 = 128 is
    # lane-dense for the output writeback.
    B, C, L, T = 2, 32, 256, 32
    key = jax.random.PRNGKey(0)
    ks = jax.random.split(key, 12)
    x = jax.random.normal(ks[0], (B, C, L), jnp.float32)
    t = jax.random.normal(ks[1], (B, T), jnp.float32)
    params = dict(
        Wt=0.05 * jax.random.normal(ks[2], (2 * C, T), jnp.float32),
        bt=0.05 * jax.random.normal(ks[3], (2 * C,), jnp.float32),
        g1=1.0 + 0.1 * jax.random.normal(ks[4], (C,), jnp.float32),
        be1=0.1 * jax.random.normal(ks[5], (C,), jnp.float32),
        W1=0.05 * jax.random.normal(ks[6], (C, C, 3), jnp.float32),
        b1=0.05 * jax.random.normal(ks[7], (C,), jnp.float32),
        g2=1.0 + 0.1 * jax.random.normal(ks[8], (C,), jnp.float32),
        be2=0.1 * jax.random.normal(ks[9], (C,), jnp.float32),
        W2=0.05 * jax.random.normal(ks[10], (C, C, 3), jnp.float32),
        b2=0.05 * jax.random.normal(ks[11], (C,), jnp.float32),
    )

    out = jax.block_until_ready(audio_downsample(x, t, params))
    assert out.shape == (B, C, L // 2)

    # Primary check: the kernel deliberately ingests bf16 x (per perf review),
    # so compare against the reference evaluated on the same bf16-rounded x;
    # remaining error is only the bf16 MXU operands with f32 accumulation.
    x_q = x.astype(jnp.bfloat16).astype(jnp.float32)
    ref_q = jax.block_until_ready(ref_forward(x_q, t, params))
    err_q = float(jnp.max(jnp.abs(out - ref_q)))
    assert jnp.allclose(out, ref_q, atol=1e-2, rtol=1e-2), f"max abs err {err_q}"

    # Secondary check: drift vs the pure-f32 reference (includes the ~2^-9
    # relative input quantization from feeding bf16 x).
    ref_f = jax.block_until_ready(ref_forward(x, t, params))
    err_f = float(jnp.max(jnp.abs(out - ref_f)))
    assert jnp.allclose(out, ref_f, atol=5e-2, rtol=5e-2), f"max abs err {err_f}"

    print("KERNEL_OK")
</pallas_src>

<mosaic_0001>
module attributes {stable_mosaic.version = 11 : i64} {
  func.func @_audio_downsample_kernel(%arg0: i32, %arg1: memref<1x2x32x128xbf16, #tpu.memory_space<vmem>>, %arg2: memref<1x32x2xf32, #tpu.memory_space<vmem>>, %arg3: memref<32x6xf32, #tpu.memory_space<vmem>>, %arg4: memref<32x96xbf16, #tpu.memory_space<vmem>>, %arg5: memref<32x96xbf16, #tpu.memory_space<vmem>>, %arg6: memref<1x32x128xf32, #tpu.memory_space<vmem>>) attributes {dimension_semantics = [#tpu.dimension_semantics<parallel>], iteration_bounds = array<i64: 2>, scalar_prefetch = 0 : i64, scratch_operands = 0 : i64, tpu.core_type = #tpu.core_type<tc>, window_params = [{transform_indices = @transform_0, window_bounds = array<i64: 1, 2, 32, 128>}, {transform_indices = @transform_1, window_bounds = array<i64: 1, 32, 2>}, {pipeline_mode = #tpu.pipeline_mode<synchronous>, transform_indices = @transform_2, window_bounds = array<i64: 32, 6>}, {pipeline_mode = #tpu.pipeline_mode<synchronous>, transform_indices = @transform_3, window_bounds = array<i64: 32, 96>}, {pipeline_mode = #tpu.pipeline_mode<synchronous>, transform_indices = @transform_4, window_bounds = array<i64: 32, 96>}, {transform_indices = @transform_5, window_bounds = array<i64: 1, 32, 128>}]} {
    %c0 = arith.constant 0 : index
    %c0_0 = arith.constant 0 : index
    %0 = vector.load %arg3[%c0, %c0_0] : memref<32x6xf32, #tpu.memory_space<vmem>>, vector<32x6xf32>
    %1 = vector.extract_strided_slice %0 {offsets = [0, 0], sizes = [32, 1], strides = [1, 1]} : vector<32x6xf32> to vector<32x1xf32>
    %2 = vector.extract_strided_slice %0 {offsets = [0, 1], sizes = [32, 1], strides = [1, 1]} : vector<32x6xf32> to vector<32x1xf32>
    %3 = vector.extract_strided_slice %0 {offsets = [0, 2], sizes = [32, 1], strides = [1, 1]} : vector<32x6xf32> to vector<32x1xf32>
    %4 = vector.extract_strided_slice %0 {offsets = [0, 3], sizes = [32, 1], strides = [1, 1]} : vector<32x6xf32> to vector<32x1xf32>
    %5 = vector.extract_strided_slice %0 {offsets = [0, 4], sizes = [32, 1], strides = [1, 1]} : vector<32x6xf32> to vector<32x1xf32>
    %6 = vector.extract_strided_slice %0 {offsets = [0, 5], sizes = [32, 1], strides = [1, 1]} : vector<32x6xf32> to vector<32x1xf32>
    %c0_1 = arith.constant 0 : index
    %c0_2 = arith.constant 0 : index
    %7 = vector.load %arg4[%c0_1, %c0_2] : memref<32x96xbf16, #tpu.memory_space<vmem>>, vector<32x96xbf16>
    %c0_3 = arith.constant 0 : index
    %c0_4 = arith.constant 0 : index
    %8 = vector.load %arg5[%c0_3, %c0_4] : memref<32x96xbf16, #tpu.memory_space<vmem>>, vector<32x96xbf16>
    %9 = tpu.iota {dimensions = array<i32: 1>} : vector<1x128xi32>
    %c0_i32 = arith.constant 0 : i32
    %10 = vector.broadcast %c0_i32 : i32 to vector<1x128xi32>
    %11 = arith.cmpi eq, %9, %10 : vector<1x128xi32>
    %c127_i32 = arith.constant 127 : i32
    %12 = vector.broadcast %c127_i32 : i32 to vector<1x128xi32>
    %13 = arith.cmpi eq, %9, %12 : vector<1x128xi32>
    %c0_5 = arith.constant 0 : index
    %c0_6 = arith.constant 0 : index
    %c0_7 = arith.constant 0 : index
    %14 = vector.load %arg2[%c0_5, %c0_6, %c0_7] : memref<1x32x2xf32, #tpu.memory_space<vmem>>, vector<1x32x2xf32>
    %15 = vector.shape_cast %14 : vector<1x32x2xf32> to vector<32x2xf32>
    %16 = vector.extract_strided_slice %15 {offsets = [0, 0], sizes = [32, 1], strides = [1, 1]} : vector<32x2xf32> to vector<32x1xf32>
    %17 = vector.extract_strided_slice %15 {offsets = [0, 1], sizes = [32, 1], strides = [1, 1]} : vector<32x2xf32> to vector<32x1xf32>
    %cst = arith.constant 0.000000e+00 : f32
    %18 = vector.broadcast %cst : f32 to vector<32x1xf32>
    %cst_8 = arith.constant 0.000000e+00 : f32
    %19 = vector.broadcast %cst_8 : f32 to vector<32x128xf32>
    %c0_9 = arith.constant 0 : index
    %c0_10 = arith.constant 0 : index
    %c0_11 = arith.constant 0 : index
    %c0_12 = arith.constant 0 : index
    %20 = vector.load %arg1[%c0_9, %c0_10, %c0_11, %c0_12] : memref<1x2x32x128xbf16, #tpu.memory_space<vmem>>, vector<1x1x32x128xbf16>
    %21 = vector.shape_cast %20 : vector<1x1x32x128xbf16> to vector<32x128xbf16>
    %22 = arith.extf %21 : vector<32x128xbf16> to vector<32x128xf32>
    %cst_13 = arith.constant dense<0.000000e+00> : vector<32xf32>
    %23 = vector.multi_reduction <add>, %22, %cst_13 [1] : vector<32x128xf32> to vector<32xf32>
    %24 = vector.shape_cast %23 : vector<32xf32> to vector<32x1xf32>
    %25 = arith.addf %18, %24 : vector<32x1xf32>
    %26 = arith.addf %19, %22 : vector<32x128xf32>
    %c0_14 = arith.constant 0 : index
    %c1 = arith.constant 1 : index
    %c0_15 = arith.constant 0 : index
    %c0_16 = arith.constant 0 : index
    %27 = vector.load %arg1[%c0_14, %c1, %c0_15, %c0_16] : memref<1x2x32x128xbf16, #tpu.memory_space<vmem>>, vector<1x1x32x128xbf16>
    %28 = vector.shape_cast %27 : vector<1x1x32x128xbf16> to vector<32x128xbf16>
    %29 = arith.extf %28 : vector<32x128xbf16> to vector<32x128xf32>
    %cst_17 = arith.constant dense<0.000000e+00> : vector<32xf32>
    %30 = vector.multi_reduction <add>, %29, %cst_17 [1] : vector<32x128xf32> to vector<32xf32>
    %31 = vector.shape_cast %30 : vector<32xf32> to vector<32x1xf32>
    %32 = arith.addf %25, %31 : vector<32x1xf32>
    %33 = arith.addf %26, %29 : vector<32x128xf32>
    %cst_18 = arith.constant 5.000000e-01 : f32
    %34 = vector.broadcast %cst_18 : f32 to vector<32x128xf32>
    %35 = arith.mulf %33, %34 : vector<32x128xf32>
    %cst_19 = arith.constant 2.560000e+02 : f32
    %36 = vector.broadcast %cst_19 : f32 to vector<32x1xf32>
    %37 = arith.divf %32, %36 : vector<32x1xf32>
    %cst_20 = arith.constant 0.000000e+00 : f32
    %38 = vector.broadcast %cst_20 : f32 to vector<32x1xf32>
    %c0_21 = arith.constant 0 : index
    %c0_22 = arith.constant 0 : index
    %c0_23 = arith.constant 0 : index
    %c0_24 = arith.constant 0 : index
    %39 = vector.load %arg1[%c0_21, %c0_22, %c0_23, %c0_24] : memref<1x2x32x128xbf16, #tpu.memory_space<vmem>>, vector<1x1x32x128xbf16>
    %40 = vector.shape_cast %39 : vector<1x1x32x128xbf16> to vector<32x128xbf16>
    %41 = arith.extf %40 : vector<32x128xbf16> to vector<32x128xf32>
    %42 = vector.broadcast %37 : vector<32x1xf32> to vector<32x128xf32>
    %43 = arith.subf %41, %42 : vector<32x128xf32>
    %44 = arith.mulf %43, %43 : vector<32x128xf32>
    %cst_25 = arith.constant dense<0.000000e+00> : vector<32xf32>
    %45 = vector.multi_reduction <add>, %44, %cst_25 [1] : vector<32x128xf32> to vector<32xf32>
    %46 = vector.shape_cast %45 : vector<32xf32> to vector<32x1xf32>
    %47 = arith.addf %38, %46 : vector<32x1xf32>
    %c0_26 = arith.constant 0 : index
    %c1_27 = arith.constant 1 : index
    %c0_28 = arith.constant 0 : index
    %c0_29 = arith.constant 0 : index
    %48 = vector.load %arg1[%c0_26, %c1_27, %c0_28, %c0_29] : memref<1x2x32x128xbf16, #tpu.memory_space<vmem>>, vector<1x1x32x128xbf16>
    %49 = vector.shape_cast %48 : vector<1x1x32x128xbf16> to vector<32x128xbf16>
    %50 = arith.extf %49 : vector<32x128xbf16> to vector<32x128xf32>
    %51 = vector.broadcast %37 : vector<32x1xf32> to vector<32x128xf32>
    %52 = arith.subf %50, %51 : vector<32x128xf32>
    %53 = arith.mulf %52, %52 : vector<32x128xf32>
    %cst_30 = arith.constant dense<0.000000e+00> : vector<32xf32>
    %54 = vector.multi_reduction <add>, %53, %cst_30 [1] : vector<32x128xf32> to vector<32xf32>
    %55 = vector.shape_cast %54 : vector<32xf32> to vector<32x1xf32>
    %56 = arith.addf %47, %55 : vector<32x1xf32>
    %cst_31 = arith.constant 2.560000e+02 : f32
    %57 = vector.broadcast %cst_31 : f32 to vector<32x1xf32>
    %58 = arith.divf %56, %57 : vector<32x1xf32>
    %cst_32 = arith.constant 9.99999974E-6 : f32
    %59 = vector.broadcast %cst_32 : f32 to vector<32x1xf32>
    %60 = arith.addf %58, %59 : vector<32x1xf32>
    %61 = math.rsqrt %60 : vector<32x1xf32>
    %62 = arith.mulf %61, %1 : vector<32x1xf32>
    %cst_33 = arith.constant 0.000000e+00 : f32
    %63 = vector.broadcast %cst_33 : f32 to vector<32x128xf32>
    %c0_34 = arith.constant 0 : index
    %c0_35 = arith.constant 0 : index
    %c0_36 = arith.constant 0 : index
    %c0_37 = arith.constant 0 : index
    %64 = vector.load %arg1[%c0_34, %c0_35, %c0_36, %c0_37] : memref<1x2x32x128xbf16, #tpu.memory_space<vmem>>, vector<1x1x32x128xbf16>
    %65 = vector.shape_cast %64 : vector<1x1x32x128xbf16> to vector<32x128xbf16>
    %66 = arith.extf %65 : vector<32x128xbf16> to vector<32x128xf32>
    %67 = vector.broadcast %37 : vector<32x1xf32> to vector<32x128xf32>
    %68 = arith.subf %66, %67 : vector<32x128xf32>
    %69 = vector.broadcast %62 : vector<32x1xf32> to vector<32x128xf32>
    %70 = arith.mulf %68, %69 : vector<32x128xf32>
    %71 = vector.broadcast %2 : vector<32x1xf32> to vector<32x128xf32>
    %72 = arith.addf %70, %71 : vector<32x128xf32>
    %73 = arith.negf %72 : vector<32x128xf32>
    %74 = math.exp %73 : vector<32x128xf32>
    %cst_38 = arith.constant 1.000000e+00 : f32
    %75 = vector.broadcast %cst_38 : f32 to vector<32x128xf32>
    %76 = arith.addf %75, %74 : vector<32x128xf32>
    %77 = arith.divf %75, %76 : vector<32x128xf32>
    %78 = arith.mulf %72, %77 : vector<32x128xf32>
    %79 = arith.addf %63, %78 : vector<32x128xf32>
    %c0_39 = arith.constant 0 : index
    %c1_40 = arith.constant 1 : index
    %c0_41 = arith.constant 0 : index
    %c0_42 = arith.constant 0 : index
    %80 = vector.load %arg1[%c0_39, %c1_40, %c0_41, %c0_42] : memref<1x2x32x128xbf16, #tpu.memory_space<vmem>>, vector<1x1x32x128xbf16>
    %81 = vector.shape_cast %80 : vector<1x1x32x128xbf16> to vector<32x128xbf16>
    %82 = arith.extf %81 : vector<32x128xbf16> to vector<32x128xf32>
    %83 = vector.broadcast %37 : vector<32x1xf32> to vector<32x128xf32>
    %84 = arith.subf %82, %83 : vector<32x128xf32>
    %85 = vector.broadcast %62 : vector<32x1xf32> to vector<32x128xf32>
    %86 = arith.mulf %84, %85 : vector<32x128xf32>
    %87 = vector.broadcast %2 : vector<32x1xf32> to vector<32x128xf32>
    %88 = arith.addf %86, %87 : vector<32x128xf32>
    %89 = arith.negf %88 : vector<32x128xf32>
    %90 = math.exp %89 : vector<32x128xf32>
    %cst_43 = arith.constant 1.000000e+00 : f32
    %91 = vector.broadcast %cst_43 : f32 to vector<32x128xf32>
    %92 = arith.addf %91, %90 : vector<32x128xf32>
    %93 = arith.divf %91, %92 : vector<32x128xf32>
    %94 = arith.mulf %88, %93 : vector<32x128xf32>
    %95 = arith.addf %79, %94 : vector<32x128xf32>
    %cst_44 = arith.constant 5.000000e-01 : f32
    %96 = vector.broadcast %cst_44 : f32 to vector<32x128xf32>
    %97 = arith.mulf %95, %96 : vector<32x128xf32>
    %c1_i32 = arith.constant 1 : i32
    %98 = tpu.dynamic_rotate %97 by %c1_i32 dim 1 : vector<32x128xf32>, i32 -> vector<32x128xf32>
    %cst_45 = arith.constant 0.000000e+00 : f32
    %99 = vector.shape_cast %11 : vector<1x128xi1> to vector<1x128xi1>
    %100 = vector.broadcast %99 : vector<1x128xi1> to vector<32x128xi1>
    %101 = vector.broadcast %cst_45 : f32 to vector<32x128xf32>
    %102 = arith.select %100, %101, %98 : vector<32x128xi1>, vector<32x128xf32>
    %103 = arith.truncf %102 : vector<32x128xf32> to vector<32x128xbf16>
    %104 = arith.truncf %97 : vector<32x128xf32> to vector<32x128xbf16>
    %c127_i32_46 = arith.constant 127 : i32
    %105 = tpu.dynamic_rotate %97 by %c127_i32_46 dim 1 : vector<32x128xf32>, i32 -> vector<32x128xf32>
    %cst_47 = arith.constant 0.000000e+00 : f32
    %106 = vector.shape_cast %13 : vector<1x128xi1> to vector<1x128xi1>
    %107 = vector.broadcast %106 : vector<1x128xi1> to vector<32x128xi1>
    %108 = vector.broadcast %cst_47 : f32 to vector<32x128xf32>
    %109 = arith.select %107, %108, %105 : vector<32x128xi1>, vector<32x128xf32>
    %110 = arith.truncf %109 : vector<32x128xf32> to vector<32x128xbf16>
    %111 = tpu.concatenate %103, %104, %110 in 0 : vector<32x128xbf16>, vector<32x128xbf16>, vector<32x128xbf16> -> vector<96x128xbf16>
    %cst_48 = arith.constant dense<0.000000e+00> : vector<32x128xf32>
    %112 = tpu.matmul %7, %111, %cst_48 {dimension_numbers = #tpu.dot_dimension_numbers<[1], [0], [0], [1], [0, 0, 1, 1], [], []>} : vector<32x96xbf16>, vector<96x128xbf16>, vector<32x128xf32> -> vector<32x128xf32>
    %113 = vector.broadcast %3 : vector<32x1xf32> to vector<32x128xf32>
    %114 = arith.addf %112, %113 : vector<32x128xf32>
    %cst_49 = arith.constant dense<0.000000e+00> : vector<32xf32>
    %115 = vector.multi_reduction <add>, %114, %cst_49 [1] : vector<32x128xf32> to vector<32xf32>
    %116 = vector.shape_cast %115 : vector<32xf32> to vector<32x1xf32>
    %cst_50 = arith.constant 1.280000e+02 : f32
    %117 = vector.broadcast %cst_50 : f32 to vector<32x1xf32>
    %118 = arith.divf %116, %117 : vector<32x1xf32>
    %119 = vector.broadcast %118 : vector<32x1xf32> to vector<32x128xf32>
    %120 = arith.subf %114, %119 : vector<32x128xf32>
    %121 = arith.mulf %120, %120 : vector<32x128xf32>
    %cst_51 = arith.constant dense<0.000000e+00> : vector<32xf32>
    %122 = vector.multi_reduction <add>, %121, %cst_51 [1] : vector<32x128xf32> to vector<32xf32>
    %123 = vector.shape_cast %122 : vector<32xf32> to vector<32x1xf32>
    %cst_52 = arith.constant 1.280000e+02 : f32
    %124 = vector.broadcast %cst_52 : f32 to vector<32x1xf32>
    %125 = arith.divf %123, %124 : vector<32x1xf32>
    %cst_53 = arith.constant 9.99999974E-6 : f32
    %126 = vector.broadcast %cst_53 : f32 to vector<32x1xf32>
    %127 = arith.addf %125, %126 : vector<32x1xf32>
    %128 = math.rsqrt %127 : vector<32x1xf32>
    %129 = arith.mulf %128, %4 : vector<32x1xf32>
    %130 = vector.broadcast %129 : vector<32x1xf32> to vector<32x128xf32>
    %131 = arith.mulf %120, %130 : vector<32x128xf32>
    %132 = vector.broadcast %5 : vector<32x1xf32> to vector<32x128xf32>
    %133 = arith.addf %131, %132 : vector<32x128xf32>
    %134 = vector.broadcast %16 : vector<32x1xf32> to vector<32x128xf32>
    %135 = arith.mulf %134, %133 : vector<32x128xf32>
    %136 = vector.broadcast %17 : vector<32x1xf32> to vector<32x128xf32>
    %137 = arith.addf %136, %135 : vector<32x128xf32>
    %138 = arith.negf %137 : vector<32x128xf32>
    %139 = math.exp %138 : vector<32x128xf32>
    %cst_54 = arith.constant 1.000000e+00 : f32
    %140 = vector.broadcast %cst_54 : f32 to vector<32x128xf32>
    %141 = arith.addf %140, %139 : vector<32x128xf32>
    %142 = arith.divf %140, %141 : vector<32x128xf32>
    %143 = arith.mulf %137, %142 : vector<32x128xf32>
    %c1_i32_55 = arith.constant 1 : i32
    %144 = tpu.dynamic_rotate %143 by %c1_i32_55 dim 1 : vector<32x128xf32>, i32 -> vector<32x128xf32>
    %cst_56 = arith.constant 0.000000e+00 : f32
    %145 = vector.shape_cast %11 : vector<1x128xi1> to vector<1x128xi1>
    %146 = vector.broadcast %145 : vector<1x128xi1> to vector<32x128xi1>
    %147 = vector.broadcast %cst_56 : f32 to vector<32x128xf32>
    %148 = arith.select %146, %147, %144 : vector<32x128xi1>, vector<32x128xf32>
    %149 = arith.truncf %148 : vector<32x128xf32> to vector<32x128xbf16>
    %150 = arith.truncf %143 : vector<32x128xf32> to vector<32x128xbf16>
    %c127_i32_57 = arith.constant 127 : i32
    %151 = tpu.dynamic_rotate %143 by %c127_i32_57 dim 1 : vector<32x128xf32>, i32 -> vector<32x128xf32>
    %cst_58 = arith.constant 0.000000e+00 : f32
    %152 = vector.shape_cast %13 : vector<1x128xi1> to vector<1x128xi1>
    %153 = vector.broadcast %152 : vector<1x128xi1> to vector<32x128xi1>
    %154 = vector.broadcast %cst_58 : f32 to vector<32x128xf32>
    %155 = arith.select %153, %154, %151 : vector<32x128xi1>, vector<32x128xf32>
    %156 = arith.truncf %155 : vector<32x128xf32> to vector<32x128xbf16>
    %157 = tpu.concatenate %149, %150, %156 in 0 : vector<32x128xbf16>, vector<32x128xbf16>, vector<32x128xbf16> -> vector<96x128xbf16>
    %cst_59 = arith.constant dense<0.000000e+00> : vector<32x128xf32>
    %158 = tpu.matmul %8, %157, %cst_59 {dimension_numbers = #tpu.dot_dimension_numbers<[1], [0], [0], [1], [0, 0, 1, 1], [], []>} : vector<32x96xbf16>, vector<96x128xbf16>, vector<32x128xf32> -> vector<32x128xf32>
    %159 = vector.broadcast %6 : vector<32x1xf32> to vector<32x128xf32>
    %160 = arith.addf %158, %159 : vector<32x128xf32>
    %161 = arith.addf %160, %35 : vector<32x128xf32>
    %c0_60 = arith.constant 0 : index
    %c0_61 = arith.constant 0 : index
    %c0_62 = arith.constant 0 : index
    %162 = vector.load %arg6[%c0_60, %c0_61, %c0_62] : memref<1x32x128xf32, #tpu.memory_space<vmem>>, vector<1x32x128xf32>
    %163 = vector.shape_cast %162 : vector<1x32x128xf32> to vector<32x128xf32>
    %164 = vector.shape_cast %161 : vector<32x128xf32> to vector<1x32x128xf32>
    tpu.vector_store %arg6[%c0_60, %c0_61, %c0_62], %164 {strides = array<i32>} : memref<1x32x128xf32, #tpu.memory_space<vmem>>, vector<1x32x128xf32>,
    return
  }
  func.func @transform_0(%arg0: i32) -> (i32, i32, i32, i32) {
    %c0_i32 = arith.constant 0 : i32
    %c0_i32_0 = arith.constant 0 : i32
    %c0_i32_1 = arith.constant 0 : i32
    %c0_i32_2 = arith.constant 0 : i32
    return %arg0, %c0_i32, %c0_i32_0, %c0_i32_1 : i32, i32, i32, i32
  }
  func.func @transform_1(%arg0: i32) -> (i32, i32, i32) {
    %c0_i32 = arith.constant 0 : i32
    %c0_i32_0 = arith.constant 0 : i32
    %c0_i32_1 = arith.constant 0 : i32
    return %arg0, %c0_i32, %c0_i32_0 : i32, i32, i32
  }
  func.func @transform_2(%arg0: i32) -> (i32, i32) {
    %c0_i32 = arith.constant 0 : i32
    %c0_i32_0 = arith.constant 0 : i32
    %c0_i32_1 = arith.constant 0 : i32
    return %c0_i32, %c0_i32_0 : i32, i32
  }
  func.func @transform_3(%arg0: i32) -> (i32, i32) {
    %c0_i32 = arith.constant 0 : i32
    %c0_i32_0 = arith.constant 0 : i32
    %c0_i32_1 = arith.constant 0 : i32
    return %c0_i32, %c0_i32_0 : i32, i32
  }
  func.func @transform_4(%arg0: i32) -> (i32, i32) {
    %c0_i32 = arith.constant 0 : i32
    %c0_i32_0 = arith.constant 0 : i32
    %c0_i32_1 = arith.constant 0 : i32
    return %c0_i32, %c0_i32_0 : i32, i32
  }
  func.func @transform_5(%arg0: i32) -> (i32, i32, i32) {
    %c0_i32 = arith.constant 0 : i32
    %c0_i32_0 = arith.constant 0 : i32
    %c0_i32_1 = arith.constant 0 : i32
    return %arg0, %c0_i32, %c0_i32_0 : i32, i32, i32
  }
}

module attributes {stable_mosaic.version = 11 : i64} {
  func.func @_audio_downsample_kernel(%arg0: i32, %arg1: memref<1x2x32x128xbf16, #tpu.memory_space<vmem>>, %arg2: memref<1x32x2xf32, #tpu.memory_space<vmem>>, %arg3: memref<32x6xf32, #tpu.memory_space<vmem>>, %arg4: memref<32x96xbf16, #tpu.memory_space<vmem>>, %arg5: memref<32x96xbf16, #tpu.memory_space<vmem>>, %arg6: memref<1x32x128xf32, #tpu.memory_space<vmem>>) attributes {dimension_semantics = [#tpu.dimension_semantics<parallel>], iteration_bounds = array<i64: 2>, scalar_prefetch = 0 : i64, scratch_operands = 0 : i64, tpu.core_type = #tpu.core_type<tc>, window_params = [{transform_indices = @transform_0, window_bounds = array<i64: 1, 2, 32, 128>}, {transform_indices = @transform_1, window_bounds = array<i64: 1, 32, 2>}, {pipeline_mode = #tpu.pipeline_mode<synchronous>, transform_indices = @transform_2, window_bounds = array<i64: 32, 6>}, {pipeline_mode = #tpu.pipeline_mode<synchronous>, transform_indices = @transform_3, window_bounds = array<i64: 32, 96>}, {pipeline_mode = #tpu.pipeline_mode<synchronous>, transform_indices = @transform_4, window_bounds = array<i64: 32, 96>}, {transform_indices = @transform_5, window_bounds = array<i64: 1, 32, 128>}]} {
    %c0 = arith.constant 0 : index
    %c0_0 = arith.constant 0 : index
    %0 = vector.load %arg3[%c0, %c0_0] : memref<32x6xf32, #tpu.memory_space<vmem>>, vector<32x6xf32>
    %1 = vector.extract_strided_slice %0 {offsets = [0, 0], sizes = [32, 1], strides = [1, 1]} : vector<32x6xf32> to vector<32x1xf32>
    %2 = vector.extract_strided_slice %0 {offsets = [0, 1], sizes = [32, 1], strides = [1, 1]} : vector<32x6xf32> to vector<32x1xf32>
    %3 = vector.extract_strided_slice %0 {offsets = [0, 2], sizes = [32, 1], strides = [1, 1]} : vector<32x6xf32> to vector<32x1xf32>
    %4 = vector.extract_strided_slice %0 {offsets = [0, 3], sizes = [32, 1], strides = [1, 1]} : vector<32x6xf32> to vector<32x1xf32>
    %5 = vector.extract_strided_slice %0 {offsets = [0, 4], sizes = [32, 1], strides = [1, 1]} : vector<32x6xf32> to vector<32x1xf32>
    %6 = vector.extract_strided_slice %0 {offsets = [0, 5], sizes = [32, 1], strides = [1, 1]} : vector<32x6xf32> to vector<32x1xf32>
    %c0_1 = arith.constant 0 : index
    %c0_2 = arith.constant 0 : index
    %7 = vector.load %arg4[%c0_1, %c0_2] : memref<32x96xbf16, #tpu.memory_space<vmem>>, vector<32x96xbf16>
    %c0_3 = arith.constant 0 : index
    %c0_4 = arith.constant 0 : index
    %8 = vector.load %arg5[%c0_3, %c0_4] : memref<32x96xbf16, #tpu.memory_space<vmem>>, vector<32x96xbf16>
    %9 = tpu.iota {dimensions = array<i32: 1>} : vector<1x128xi32>
    %c0_i32 = arith.constant 0 : i32
    %10 = vector.broadcast %c0_i32 : i32 to vector<1x128xi32>
    %11 = arith.cmpi eq, %9, %10 : vector<1x128xi32>
    %c127_i32 = arith.constant 127 : i32
    %12 = vector.broadcast %c127_i32 : i32 to vector<1x128xi32>
    %13 = arith.cmpi eq, %9, %12 : vector<1x128xi32>
    %c0_5 = arith.constant 0 : index
    %c0_6 = arith.constant 0 : index
    %c0_7 = arith.constant 0 : index
    %14 = vector.load %arg2[%c0_5, %c0_6, %c0_7] : memref<1x32x2xf32, #tpu.memory_space<vmem>>, vector<1x32x2xf32>
    %15 = vector.shape_cast %14 : vector<1x32x2xf32> to vector<32x2xf32>
    %16 = vector.extract_strided_slice %15 {offsets = [0, 0], sizes = [32, 1], strides = [1, 1]} : vector<32x2xf32> to vector<32x1xf32>
    %17 = vector.extract_strided_slice %15 {offsets = [0, 1], sizes = [32, 1], strides = [1, 1]} : vector<32x2xf32> to vector<32x1xf32>
    %cst = arith.constant 0.000000e+00 : f32
    %18 = vector.broadcast %cst : f32 to vector<32x1xf32>
    %cst_8 = arith.constant 0.000000e+00 : f32
    %19 = vector.broadcast %cst_8 : f32 to vector<32x128xf32>
    %c0_9 = arith.constant 0 : index
    %c0_10 = arith.constant 0 : index
    %c0_11 = arith.constant 0 : index
    %c0_12 = arith.constant 0 : index
    %20 = vector.load %arg1[%c0_9, %c0_10, %c0_11, %c0_12] : memref<1x2x32x128xbf16, #tpu.memory_space<vmem>>, vector<1x1x32x128xbf16>
    %21 = vector.shape_cast %20 : vector<1x1x32x128xbf16> to vector<32x128xbf16>
    %22 = arith.extf %21 : vector<32x128xbf16> to vector<32x128xf32>
    %cst_13 = arith.constant dense<0.000000e+00> : vector<32xf32>
    %23 = vector.multi_reduction <add>, %22, %cst_13 [1] : vector<32x128xf32> to vector<32xf32>
    %24 = vector.shape_cast %23 : vector<32xf32> to vector<32x1xf32>
    %25 = arith.addf %18, %24 : vector<32x1xf32>
    %26 = arith.addf %19, %22 : vector<32x128xf32>
    %c0_14 = arith.constant 0 : index
    %c1 = arith.constant 1 : index
    %c0_15 = arith.constant 0 : index
    %c0_16 = arith.constant 0 : index
    %27 = vector.load %arg1[%c0_14, %c1, %c0_15, %c0_16] : memref<1x2x32x128xbf16, #tpu.memory_space<vmem>>, vector<1x1x32x128xbf16>
    %28 = vector.shape_cast %27 : vector<1x1x32x128xbf16> to vector<32x128xbf16>
    %29 = arith.extf %28 : vector<32x128xbf16> to vector<32x128xf32>
    %cst_17 = arith.constant dense<0.000000e+00> : vector<32xf32>
    %30 = vector.multi_reduction <add>, %29, %cst_17 [1] : vector<32x128xf32> to vector<32xf32>
    %31 = vector.shape_cast %30 : vector<32xf32> to vector<32x1xf32>
    %32 = arith.addf %25, %31 : vector<32x1xf32>
    %33 = arith.addf %26, %29 : vector<32x128xf32>
    %cst_18 = arith.constant 5.000000e-01 : f32
    %34 = vector.broadcast %cst_18 : f32 to vector<32x128xf32>
    %35 = arith.mulf %33, %34 : vector<32x128xf32>
    %cst_19 = arith.constant 2.560000e+02 : f32
    %36 = vector.broadcast %cst_19 : f32 to vector<32x1xf32>
    %37 = arith.divf %32, %36 : vector<32x1xf32>
    %cst_20 = arith.constant 0.000000e+00 : f32
    %38 = vector.broadcast %cst_20 : f32 to vector<32x1xf32>
    %c0_21 = arith.constant 0 : index
    %c0_22 = arith.constant 0 : index
    %c0_23 = arith.constant 0 : index
    %c0_24 = arith.constant 0 : index
    %39 = vector.load %arg1[%c0_21, %c0_22, %c0_23, %c0_24] : memref<1x2x32x128xbf16, #tpu.memory_space<vmem>>, vector<1x1x32x128xbf16>
    %40 = vector.shape_cast %39 : vector<1x1x32x128xbf16> to vector<32x128xbf16>
    %41 = arith.extf %40 : vector<32x128xbf16> to vector<32x128xf32>
    %42 = vector.broadcast %37 : vector<32x1xf32> to vector<32x128xf32>
    %43 = arith.subf %41, %42 : vector<32x128xf32>
    %44 = arith.mulf %43, %43 : vector<32x128xf32>
    %cst_25 = arith.constant dense<0.000000e+00> : vector<32xf32>
    %45 = vector.multi_reduction <add>, %44, %cst_25 [1] : vector<32x128xf32> to vector<32xf32>
    %46 = vector.shape_cast %45 : vector<32xf32> to vector<32x1xf32>
    %47 = arith.addf %38, %46 : vector<32x1xf32>
    %c0_26 = arith.constant 0 : index
    %c1_27 = arith.constant 1 : index
    %c0_28 = arith.constant 0 : index
    %c0_29 = arith.constant 0 : index
    %48 = vector.load %arg1[%c0_26, %c1_27, %c0_28, %c0_29] : memref<1x2x32x128xbf16, #tpu.memory_space<vmem>>, vector<1x1x32x128xbf16>
    %49 = vector.shape_cast %48 : vector<1x1x32x128xbf16> to vector<32x128xbf16>
    %50 = arith.extf %49 : vector<32x128xbf16> to vector<32x128xf32>
    %51 = vector.broadcast %37 : vector<32x1xf32> to vector<32x128xf32>
    %52 = arith.subf %50, %51 : vector<32x128xf32>
    %53 = arith.mulf %52, %52 : vector<32x128xf32>
    %cst_30 = arith.constant dense<0.000000e+00> : vector<32xf32>
    %54 = vector.multi_reduction <add>, %53, %cst_30 [1] : vector<32x128xf32> to vector<32xf32>
    %55 = vector.shape_cast %54 : vector<32xf32> to vector<32x1xf32>
    %56 = arith.addf %47, %55 : vector<32x1xf32>
    %cst_31 = arith.constant 2.560000e+02 : f32
    %57 = vector.broadcast %cst_31 : f32 to vector<32x1xf32>
    %58 = arith.divf %56, %57 : vector<32x1xf32>
    %cst_32 = arith.constant 9.99999974E-6 : f32
    %59 = vector.broadcast %cst_32 : f32 to vector<32x1xf32>
    %60 = arith.addf %58, %59 : vector<32x1xf32>
    %61 = math.rsqrt %60 : vector<32x1xf32>
    %62 = arith.mulf %61, %1 : vector<32x1xf32>
    %cst_33 = arith.constant 0.000000e+00 : f32
    %63 = vector.broadcast %cst_33 : f32 to vector<32x128xf32>
    %c0_34 = arith.constant 0 : index
    %c0_35 = arith.constant 0 : index
    %c0_36 = arith.constant 0 : index
    %c0_37 = arith.constant 0 : index
    %64 = vector.load %arg1[%c0_34, %c0_35, %c0_36, %c0_37] : memref<1x2x32x128xbf16, #tpu.memory_space<vmem>>, vector<1x1x32x128xbf16>
    %65 = vector.shape_cast %64 : vector<1x1x32x128xbf16> to vector<32x128xbf16>
    %66 = arith.extf %65 : vector<32x128xbf16> to vector<32x128xf32>
    %67 = vector.broadcast %37 : vector<32x1xf32> to vector<32x128xf32>
    %68 = arith.subf %66, %67 : vector<32x128xf32>
    %69 = vector.broadcast %62 : vector<32x1xf32> to vector<32x128xf32>
    %70 = arith.mulf %68, %69 : vector<32x128xf32>
    %71 = vector.broadcast %2 : vector<32x1xf32> to vector<32x128xf32>
    %72 = arith.addf %70, %71 : vector<32x128xf32>
    %73 = arith.negf %72 : vector<32x128xf32>
    %74 = math.exp %73 : vector<32x128xf32>
    %cst_38 = arith.constant 1.000000e+00 : f32
    %75 = vector.broadcast %cst_38 : f32 to vector<32x128xf32>
    %76 = arith.addf %75, %74 : vector<32x128xf32>
    %77 = arith.divf %75, %76 : vector<32x128xf32>
    %78 = arith.mulf %72, %77 : vector<32x128xf32>
    %79 = arith.addf %63, %78 : vector<32x128xf32>
    %c0_39 = arith.constant 0 : index
    %c1_40 = arith.constant 1 : index
    %c0_41 = arith.constant 0 : index
    %c0_42 = arith.constant 0 : index
    %80 = vector.load %arg1[%c0_39, %c1_40, %c0_41, %c0_42] : memref<1x2x32x128xbf16, #tpu.memory_space<vmem>>, vector<1x1x32x128xbf16>
    %81 = vector.shape_cast %80 : vector<1x1x32x128xbf16> to vector<32x128xbf16>
    %82 = arith.extf %81 : vector<32x128xbf16> to vector<32x128xf32>
    %83 = vector.broadcast %37 : vector<32x1xf32> to vector<32x128xf32>
    %84 = arith.subf %82, %83 : vector<32x128xf32>
    %85 = vector.broadcast %62 : vector<32x1xf32> to vector<32x128xf32>
    %86 = arith.mulf %84, %85 : vector<32x128xf32>
    %87 = vector.broadcast %2 : vector<32x1xf32> to vector<32x128xf32>
    %88 = arith.addf %86, %87 : vector<32x128xf32>
    %89 = arith.negf %88 : vector<32x128xf32>
    %90 = math.exp %89 : vector<32x128xf32>
    %cst_43 = arith.constant 1.000000e+00 : f32
    %91 = vector.broadcast %cst_43 : f32 to vector<32x128xf32>
    %92 = arith.addf %91, %90 : vector<32x128xf32>
    %93 = arith.divf %91, %92 : vector<32x128xf32>
    %94 = arith.mulf %88, %93 : vector<32x128xf32>
    %95 = arith.addf %79, %94 : vector<32x128xf32>
    %cst_44 = arith.constant 5.000000e-01 : f32
    %96 = vector.broadcast %cst_44 : f32 to vector<32x128xf32>
    %97 = arith.mulf %95, %96 : vector<32x128xf32>
    %c1_i32 = arith.constant 1 : i32
    %98 = tpu.dynamic_rotate %97 by %c1_i32 dim 1 : vector<32x128xf32>, i32 -> vector<32x128xf32>
    %cst_45 = arith.constant 0.000000e+00 : f32
    %99 = vector.shape_cast %11 : vector<1x128xi1> to vector<1x128xi1>
    %100 = vector.broadcast %99 : vector<1x128xi1> to vector<32x128xi1>
    %101 = vector.broadcast %cst_45 : f32 to vector<32x128xf32>
    %102 = arith.select %100, %101, %98 : vector<32x128xi1>, vector<32x128xf32>
    %103 = arith.truncf %102 : vector<32x128xf32> to vector<32x128xbf16>
    %104 = arith.truncf %97 : vector<32x128xf32> to vector<32x128xbf16>
    %c127_i32_46 = arith.constant 127 : i32
    %105 = tpu.dynamic_rotate %97 by %c127_i32_46 dim 1 : vector<32x128xf32>, i32 -> vector<32x128xf32>
    %cst_47 = arith.constant 0.000000e+00 : f32
    %106 = vector.shape_cast %13 : vector<1x128xi1> to vector<1x128xi1>
    %107 = vector.broadcast %106 : vector<1x128xi1> to vector<32x128xi1>
    %108 = vector.broadcast %cst_47 : f32 to vector<32x128xf32>
    %109 = arith.select %107, %108, %105 : vector<32x128xi1>, vector<32x128xf32>
    %110 = arith.truncf %109 : vector<32x128xf32> to vector<32x128xbf16>
    %111 = tpu.concatenate %103, %104, %110 in 0 : vector<32x128xbf16>, vector<32x128xbf16>, vector<32x128xbf16> -> vector<96x128xbf16>
    %cst_48 = arith.constant dense<0.000000e+00> : vector<32x128xf32>
    %112 = tpu.matmul %7, %111, %cst_48 {dimension_numbers = #tpu.dot_dimension_numbers<[1], [0], [0], [1], [0, 0, 1, 1], [], []>} : vector<32x96xbf16>, vector<96x128xbf16>, vector<32x128xf32> -> vector<32x128xf32>
    %113 = vector.broadcast %3 : vector<32x1xf32> to vector<32x128xf32>
    %114 = arith.addf %112, %113 : vector<32x128xf32>
    %cst_49 = arith.constant dense<0.000000e+00> : vector<32xf32>
    %115 = vector.multi_reduction <add>, %114, %cst_49 [1] : vector<32x128xf32> to vector<32xf32>
    %116 = vector.shape_cast %115 : vector<32xf32> to vector<32x1xf32>
    %cst_50 = arith.constant 1.280000e+02 : f32
    %117 = vector.broadcast %cst_50 : f32 to vector<32x1xf32>
    %118 = arith.divf %116, %117 : vector<32x1xf32>
    %119 = vector.broadcast %118 : vector<32x1xf32> to vector<32x128xf32>
    %120 = arith.subf %114, %119 : vector<32x128xf32>
    %121 = arith.mulf %120, %120 : vector<32x128xf32>
    %cst_51 = arith.constant dense<0.000000e+00> : vector<32xf32>
    %122 = vector.multi_reduction <add>, %121, %cst_51 [1] : vector<32x128xf32> to vector<32xf32>
    %123 = vector.shape_cast %122 : vector<32xf32> to vector<32x1xf32>
    %cst_52 = arith.constant 1.280000e+02 : f32
    %124 = vector.broadcast %cst_52 : f32 to vector<32x1xf32>
    %125 = arith.divf %123, %124 : vector<32x1xf32>
    %cst_53 = arith.constant 9.99999974E-6 : f32
    %126 = vector.broadcast %cst_53 : f32 to vector<32x1xf32>
    %127 = arith.addf %125, %126 : vector<32x1xf32>
    %128 = math.rsqrt %127 : vector<32x1xf32>
    %129 = arith.mulf %128, %4 : vector<32x1xf32>
    %130 = vector.broadcast %129 : vector<32x1xf32> to vector<32x128xf32>
    %131 = arith.mulf %120, %130 : vector<32x128xf32>
    %132 = vector.broadcast %5 : vector<32x1xf32> to vector<32x128xf32>
    %133 = arith.addf %131, %132 : vector<32x128xf32>
    %134 = vector.broadcast %16 : vector<32x1xf32> to vector<32x128xf32>
    %135 = arith.mulf %134, %133 : vector<32x128xf32>
    %136 = vector.broadcast %17 : vector<32x1xf32> to vector<32x128xf32>
    %137 = arith.addf %136, %135 : vector<32x128xf32>
    %138 = arith.negf %137 : vector<32x128xf32>
    %139 = math.exp %138 : vector<32x128xf32>
    %cst_54 = arith.constant 1.000000e+00 : f32
    %140 = vector.broadcast %cst_54 : f32 to vector<32x128xf32>
    %141 = arith.addf %140, %139 : vector<32x128xf32>
    %142 = arith.divf %140, %141 : vector<32x128xf32>
    %143 = arith.mulf %137, %142 : vector<32x128xf32>
    %c1_i32_55 = arith.constant 1 : i32
    %144 = tpu.dynamic_rotate %143 by %c1_i32_55 dim 1 : vector<32x128xf32>, i32 -> vector<32x128xf32>
    %cst_56 = arith.constant 0.000000e+00 : f32
    %145 = vector.shape_cast %11 : vector<1x128xi1> to vector<1x128xi1>
    %146 = vector.broadcast %145 : vector<1x128xi1> to vector<32x128xi1>
    %147 = vector.broadcast %cst_56 : f32 to vector<32x128xf32>
    %148 = arith.select %146, %147, %144 : vector<32x128xi1>, vector<32x128xf32>
    %149 = arith.truncf %148 : vector<32x128xf32> to vector<32x128xbf16>
    %150 = arith.truncf %143 : vector<32x128xf32> to vector<32x128xbf16>
    %c127_i32_57 = arith.constant 127 : i32
    %151 = tpu.dynamic_rotate %143 by %c127_i32_57 dim 1 : vector<32x128xf32>, i32 -> vector<32x128xf32>
    %cst_58 = arith.constant 0.000000e+00 : f32
    %152 = vector.shape_cast %13 : vector<1x128xi1> to vector<1x128xi1>
    %153 = vector.broadcast %152 : vector<1x128xi1> to vector<32x128xi1>
    %154 = vector.broadcast %cst_58 : f32 to vector<32x128xf32>
    %155 = arith.select %153, %154, %151 : vector<32x128xi1>, vector<32x128xf32>
    %156 = arith.truncf %155 : vector<32x128xf32> to vector<32x128xbf16>
    %157 = tpu.concatenate %149, %150, %156 in 0 : vector<32x128xbf16>, vector<32x128xbf16>, vector<32x128xbf16> -> vector<96x128xbf16>
    %cst_59 = arith.constant dense<0.000000e+00> : vector<32x128xf32>
    %158 = tpu.matmul %8, %157, %cst_59 {dimension_numbers = #tpu.dot_dimension_numbers<[1], [0], [0], [1], [0, 0, 1, 1], [], []>} : vector<32x96xbf16>, vector<96x128xbf16>, vector<32x128xf32> -> vector<32x128xf32>
    %159 = vector.broadcast %6 : vector<32x1xf32> to vector<32x128xf32>
    %160 = arith.addf %158, %159 : vector<32x128xf32>
    %161 = arith.addf %160, %35 : vector<32x128xf32>
    %c0_60 = arith.constant 0 : index
    %c0_61 = arith.constant 0 : index
    %c0_62 = arith.constant 0 : index
    %162 = vector.load %arg6[%c0_60, %c0_61, %c0_62] : memref<1x32x128xf32, #tpu.memory_space<vmem>>, vector<1x32x128xf32>
    %163 = vector.shape_cast %162 : vector<1x32x128xf32> to vector<32x128xf32>
    %164 = vector.shape_cast %161 : vector<32x128xf32> to vector<1x32x128xf32>
    tpu.vector_store %arg6[%c0_60, %c0_61, %c0_62], %164 {strides = array<i32>} : memref<1x32x128xf32, #tpu.memory_space<vmem>>, vector<1x32x128xf32>,
    return
  }
  func.func @transform_0(%arg0: i32) -> (i32, i32, i32, i32) {
    %c0_i32 = arith.constant 0 : i32
    %c0_i32_0 = arith.constant 0 : i32
    %c0_i32_1 = arith.constant 0 : i32
    %c0_i32_2 = arith.constant 0 : i32
    return %arg0, %c0_i32, %c0_i32_0, %c0_i32_1 : i32, i32, i32, i32
  }
  func.func @transform_1(%arg0: i32) -> (i32, i32, i32) {
    %c0_i32 = arith.constant 0 : i32
    %c0_i32_0 = arith.constant 0 : i32
    %c0_i32_1 = arith.constant 0 : i32
    return %arg0, %c0_i32, %c0_i32_0 : i32, i32, i32
  }
  func.func @transform_2(%arg0: i32) -> (i32, i32) {
    %c0_i32 = arith.constant 0 : i32
    %c0_i32_0 = arith.constant 0 : i32
    %c0_i32_1 = arith.constant 0 : i32
    return %c0_i32, %c0_i32_0 : i32, i32
  }
  func.func @transform_3(%arg0: i32) -> (i32, i32) {
    %c0_i32 = arith.constant 0 : i32
    %c0_i32_0 = arith.constant 0 : i32
    %c0_i32_1 = arith.constant 0 : i32
    return %c0_i32, %c0_i32_0 : i32, i32
  }
  func.func @transform_4(%arg0: i32) -> (i32, i32) {
    %c0_i32 = arith.constant 0 : i32
    %c0_i32_0 = arith.constant 0 : i32
    %c0_i32_1 = arith.constant 0 : i32
    return %c0_i32, %c0_i32_0 : i32, i32
  }
  func.func @transform_5(%arg0: i32) -> (i32, i32, i32) {
    %c0_i32 = arith.constant 0 : i32
    %c0_i32_0 = arith.constant 0 : i32
    %c0_i32_1 = arith.constant 0 : i32
    return %arg0, %c0_i32, %c0_i32_0 : i32, i32, i32
  }
}

</mosaic_0001>

<bundles_post_ra>
// kernel: tpu_custom_call.1
= control target key start
LH: loop header
LB: loop body
LE: loop exit
PB: predicated region body
PF: predicated region fallthrough
CT: control target
= control target key end

     0   :  { %10 = vsyncpa [#allocation3], 0  ;;  %s1757_s0 = inlined_call_operand.vmem [shape: bf16[2,2,32,128], index: 0, kind: input, shape index: {}]   ;;  %s1758_s1 = inlined_call_operand.vmem [shape: f32[2,32,2], index: 1, kind: input, shape index: {}]   ;;  %s1759_s2 = inlined_call_operand.vmem [shape: f32[32,6], index: 2, kind: input, shape index: {}]   ;;  %s1760_s3 = inlined_call_operand.vmem [shape: bf16[32,96], index: 3, kind: input, shape index: {}]   ;;  %s1761_s4 = inlined_call_operand.vmem [shape: bf16[32,96], index: 4, kind: input, shape index: {}]   ;;  %s1762_s5 = inlined_call_operand.hbm [shape: f32[2,32,128], index: 5, kind: output, shape index: {}]  }
   0x1   :  { %12 = vsyncpa [#allocation3 + $0x1], 0  ;;  %s1416_s18 = smov 0   ;;  %s1418_s19 = smov 0  }
   0x2   :  { %s1420_s20 = smov 0   ;;  %s1422_s21 = smov 0  }
   0x3 LB: > { %s1437_s22 = sadd.s32 4294967295, %s1373_s21   ;;  %s986_s23 = sadd.s32 4294967294, %s1373_s21   ;;  %s1373_s21 = sphi %s1422_s21, %s1772_s21   ;;  %s1369_s20 = sphi %s1420_s20, %s1771_s20   ;;  %s1365_s19 = sphi %s1418_s19, %s1770_s19   ;;  %s1361_s18 = sphi %s1416_s18, %s1769_s18  }
   0x4   : > { %s1441_s24 = sadd.s32 1, %s1373_s21   ;;  %s140_s25 = sadd.s32 1, %s1369_s20 }
   0x5   : > { %s137_s26 = ssub.s32 %s1373_s21, %s1441_s24  ;;  %p150_p0 = scmp.ne.s32.totalorder %s1369_s20, %s1365_s19 }
   0x6   : > { %p138_p1 = scmp.eq.s32.totalorder %s137_s26, 0  ;;  %p151_p2 = scmp.eq.s32.totalorder %s1437_s22, 1 }
   0x7   : > { %p156_p3 = scmp.ne.s32.totalorder %s1365_s19, %s1361_s18  ;;  %p157_p4 = scmp.eq.s32.totalorder %s986_s23, 1 }
   0x8   : > { %s1452_s27 = scalar_select %p138_p1, %s1369_s20, %s140_s25  }
   0x9   : > { %p1454_p5 = por %p151_p2, %p150_p0  ;;  %p1458_p6 = por %p157_p4, %p156_p3 }
   0xa   : > { %p989_p7 = scmp.ge.s32.totalorder %s1373_s21, 1  ;;  %p200_p8 = scmp.lt.s32.totalorder %s1373_s21, 3 }
   0xc   : > { %p201_p9 = pnand %p989_p7, %p200_p8 }
   0xd   : > { %p233_p10 = scmp.lt.s32.totalorder (!%p201_p9), %s1437_s22, 1  ;;  %v1375_v44 = vmov (!%p201_p9), 1   ;;  %v1542_v45 = vld [vmem:[%s1759_s2] sm:$0xff] (!%p201_p9)  ;;  %v1548_v46 = vld [vmem:[%s1759_s2 + $0x8] sm:$0xff] (!%p201_p9)  ;;  %v1376_v47 = vmov (!%p201_p9), 0   ;;  %v1555_v48 = vld [vmem:[%s1759_s2 + $0x10] sm:$0xff] (!%p201_p9) }
   0xe   : > { %204 = sbr.rel (%p201_p9) target bundleno = 1744 (0x6d0), region = 40  ;;  %1186 = vset.pattern.permute.xlu1 (!%p201_p9), %v1375_v44  ;;  %1185 = vset.pattern.permute.xlu0 (!%p201_p9), %v1376_v47  ;;  %s1377_s23 = smov (!%p201_p9), 1   ;;  %vm562_vm0 = vcmask (!%p201_p9), 785408  }
   0xf   : > { %s1378_s25 = smov (!%p201_p9), 127   ;;  %s230_s15 = sand.u32 (!%p201_p9), 1, %s1365_s19  }
  0x10   : > { %s990_s16 = sshll.u32 (!%p201_p9), %s230_s15, 5  ;;  %s1383_s10 = smov (!%p201_p9), [#allocation2]  }
  0x11   : > { %s232_s17 = scalar_lea.vmem (!%p201_p9), [#allocation2], %s990_s16  ;;  %s1315_s11 = sshll.u32 (!%p201_p9), %s1383_s10, 4  ;;  %s1316_s11 = int_to_ptr.vmem [resolvable:$false] %s1315_s11 }
  0x15   : > { %s1466_s30 = scalar_select %p233_p10, %s1437_s22, 1 }
  0x17   : > { %s1064_s6 = sshll.u32 %s1466_s30, 5 }
  0x18   : > { %s237_s9 = scalar_lea.vmem %s1757_s0, %s1064_s6  ;;  %s1641_s12 = scalar_lea.vmem %s1758_s1, %s1064_s6 }
  0x19   : > { %v1084_v0 = vld [vmem:[%s237_s9 + $0x10] sm:$0xff]   ;;  %v1068_v1 = vld [vmem:[%s237_s9] sm:$0xff]   ;;  %v1083_v6 = vld [vmem:[%s237_s9 + $0x8] sm:$0xff]  }
  0x1a   : > { %v1474_v2 = vunpack.c.l.bf16 %v1084_v0  ;;  %v1476_v3 = vunpack.c.l.bf16 %v1068_v1  ;;  %v1480_v4 = vunpack.c.h.bf16 %v1084_v0  ;;  %v1482_v5 = vunpack.c.h.bf16 %v1068_v1  ;;  %v1085_v9 = vld [vmem:[%s237_s9 + $0x18] sm:$0xff]  }
  0x1b   : > { %v1486_v7 = vunpack.c.h.bf16 %v1083_v6  ;;  %v1488_v8 = vunpack.c.l.bf16 %v1083_v6  ;;  %v1492_v10 = vunpack.c.h.bf16 %v1085_v9  ;;  %v1494_v11 = vunpack.c.l.bf16 %v1085_v9 }
  0x1c   : > { %297 = vadd.xlane.f32.xlu1 %v1474_v2  ;;  %272 = vadd.xlane.f32.xlu0 %v1476_v3 }
  0x20   : > { %299 = vadd.xlane.f32.xlu1 %v1480_v4  ;;  %274 = vadd.xlane.f32.xlu0 %v1482_v5 }
  0x24   : > { %278 = vadd.xlane.f32.xlu1 %v1486_v7  ;;  %276 = vadd.xlane.f32.xlu0 %v1488_v8 }
  0x28   : > { %303 = vadd.xlane.f32.xlu1 %v1492_v10  ;;  %301 = vadd.xlane.f32.xlu0 %v1494_v11 }
  0xa9   : > { %v298_v12 = vpop.xlane.xlu1 %297  ;;  %v273_v13 = vpop.xlane.xlu0 %272 }
  0xaa   : > { %v305_v14 = vadd.f32 %v298_v12, %v273_v13 }
  0xac   : > { %v318_v15 = vmul.f32 0.00390625, %v305_v14 }
  0xad   : > { %v300_v16 = vpop.xlane.xlu1 %299  ;;  %v275_v17 = vpop.xlane.xlu0 %274 }
  0xae   : > { %v1499_v18 = vsub.f32 %v1476_v3, %v318_v15  ;;  %v306_v19 = vadd.f32 %v300_v16, %v275_v17  ;;  %v1502_v20 = vsub.f32 %v1474_v2, %v318_v15 }
  0xb0   : > { %v319_v21 = vmul.f32 0.00390625, %v306_v19  ;;  %v326_v22 = vmul.f32 %v1499_v18, %v1499_v18  ;;  %v346_v27 = vmul.f32 %v1502_v20, %v1502_v20 }
  0xb1   : > { %v279_v23 = vpop.xlane.xlu1 %278  ;;  %v277_v24 = vpop.xlane.xlu0 %276 }
  0xb2   : > { %v1507_v25 = vsub.f32 %v1482_v5, %v319_v21  ;;  %330 = vadd.xlane.f32.xlu0 %v326_v22  ;;  %v1510_v26 = vsub.f32 %v1480_v4, %v319_v21  ;;  %v1565_v22 = vld [vmem:[%s1759_s2 + $0x18] sm:$0xff] }
  0xb4   : > { %v327_v28 = vmul.f32 %v1507_v25, %v1507_v25  ;;  %v347_v35 = vmul.f32 %v1510_v26, %v1510_v26 }
  0xb5   : > { %v304_v29 = vpop.xlane.xlu1 %303  ;;  %v302_v30 = vpop.xlane.xlu0 %301 }
  0xb6   : > { %v308_v31 = vadd.f32 %v304_v29, %v279_v23  ;;  %v307_v32 = vadd.f32 %v302_v30, %v277_v24  ;;  %350 = vadd.xlane.f32.xlu0 %v346_v27  ;;  %332 = vadd.xlane.f32.xlu1 %v327_v28 }
  0xb8   : > { %v321_v33 = vmul.f32 0.00390625, %v308_v31  ;;  %v320_v34 = vmul.f32 0.00390625, %v307_v32 }
  0xba   : > { %v1519_v36 = vsub.f32 %v1486_v7, %v321_v33  ;;  %v1522_v37 = vsub.f32 %v1488_v8, %v320_v34  ;;  %352 = vadd.xlane.f32.xlu1 %v347_v35  ;;  %v1525_v38 = vsub.f32 %v1492_v10, %v321_v33  ;;  %v1528_v39 = vsub.f32 %v1494_v11, %v320_v34 }
  0xbc   : > { %v329_v40 = vmul.f32 %v1519_v36, %v1519_v36  ;;  %v328_v41 = vmul.f32 %v1522_v37, %v1522_v37  ;;  %v349_v42 = vmul.f32 %v1525_v38, %v1525_v38  ;;  %v348_v43 = vmul.f32 %v1528_v39, %v1528_v39 }
  0xbe   : > { %336 = vadd.xlane.f32.xlu1 %v329_v40  ;;  %334 = vadd.xlane.f32.xlu0 %v328_v41 }
  0xc2   : > { %356 = vadd.xlane.f32.xlu1 %v349_v42  ;;  %354 = vadd.xlane.f32.xlu0 %v348_v43 }
  0xd3   : > { %404 = vperm.xlu1 %1186, %v1542_v45  }
  0xd7   : > { %409 = vperm.xlu1 %1186, %v1548_v46  }
  0xdb   : > { %414 = vperm.xlu1 %1186, %v1555_v48  }
  0xdf   : > { %1187 = vset.pattern.permute.xlu1 %v1376_v47 }
 0x13f   : > { %v331_v49 = vpop.xlane.xlu0 %330 }
 0x143   : > { %v333_v50 = vpop.xlane.xlu1 %332  ;;  %v351_v51 = vpop.xlane.xlu0 %350 }
 0x144   : > { %v358_v52 = vadd.f32 %v351_v51, %v331_v49 }
 0x146   : > { %v362_v53 = vmul.f32 0.00390625, %v358_v52 }
 0x147   : > { %v353_v54 = vpop.xlane.xlu1 %352 }
 0x148   : > { %v366_v55 = vadd.f32 1e-05, %v362_v53  ;;  %v359_v56 = vadd.f32 %v353_v54, %v333_v50 }
 0x14a   : > { %1247 = vrsqrt.f32 %v366_v55  ;;  %v363_v57 = vmul.f32 0.00390625, %v359_v56 }
 0x14b   : > { %v337_v58 = vpop.xlane.xlu1 %336  ;;  %v335_v59 = vpop.xlane.xlu0 %334 }
 0x14c   : > { %v367_v60 = vadd.f32 1e-05, %v363_v57 }
 0x14e   : > { %1249 = vrsqrt.f32 %v367_v60 }
 0x14f   : > { %v357_v61 = vpop.xlane.xlu1 %356  ;;  %v355_v62 = vpop.xlane.xlu0 %354 }
 0x150   : > { %v361_v63 = vadd.f32 %v357_v61, %v337_v58  ;;  %v360_v0 = vadd.f32 %v355_v62, %v335_v59 }
 0x152   : > { %v365_v1 = vmul.f32 0.00390625, %v361_v63  ;;  %v364_v6 = vmul.f32 0.00390625, %v360_v0 }
 0x153   : > { %v405_v24 = vpop.permute.xlu1 %404 }
 0x154   : > { %v1248_v9 = vpop.eup %1247  ;;  %v368_v12 = vadd.f32 1e-05, %v364_v6  ;;  %v369_v13 = vadd.f32 1e-05, %v365_v1 }
 0x155   : > { %v374_v14 = vmul.f32 %v1248_v9, %v1542_v45 }
 0x156   : > { %1251 = vrsqrt.f32 %v368_v12 }
 0x157   : > { %380 = vperm.xlu0 %1185, %v374_v14   ;;  %1253 = vrsqrt.f32 %v369_v13  ;;  %v410_v27 = vpop.permute.xlu1 %409 }
 0x158   : > { %v1250_v15 = vpop.eup %1249 }
 0x159   : > { %v375_v16 = vmul.f32 %v1250_v15, %v1548_v46 }
 0x15b   : > { %385 = vperm.xlu1 %1187, %v375_v16   ;;  %v415_v28 = vpop.permute.xlu1 %414 }
 0x160   : > { %v1252_v17 = vpop.eup %1251 }
 0x161   : > { %v376_v19 = vmul.f32 %v1252_v17, %v1555_v48  ;;  %v1254_v21 = vpop.eup %1253 }
 0x162   : > { %v377_v23 = vmul.f32 %v1254_v21, %v1565_v22 }
 0x163   : > { %390 = vperm.xlu1 %1187, %v376_v19  }
 0x167   : > { %395 = vperm.xlu1 %1187, %v377_v23  }
 0x16b   : > { %1188 = vset.pattern.permute.xlu1 %v1375_v44 }
 0x16c   : > { %419 = vperm.xlu1 %1188, %v1565_v22  }
 0x1d6   : > { %v381_v29 = vpop.permute.xlu0 %380 }
 0x1d7   : > { %v398_v30 = vmul.f32 %v381_v29, %v1499_v18  ;;  %v458_v31 = vmul.f32 %v381_v29, %v1502_v20 }
 0x1d9   : > { %v422_v32 = vadd.f32 %v405_v24, %v398_v30  ;;  %v462_v33 = vadd.f32 %v458_v31, %v405_v24 }
 0x1da   : > { %v386_v34 = vpop.permute.xlu1 %385 }
 0x1db   : > { %v999_v35 = vmul.f32 -1.442695, %v422_v32  ;;  %v1003_v40 = vmul.f32 -1.442695, %v462_v33  ;;  %v399_v41 = vmul.f32 %v386_v34, %v1507_v25  ;;  %v459_v42 = vmul.f32 %v386_v34, %v1510_v26 }
 0x1dd   : > { %1255 = vpow2.f32 %v999_v35  ;;  %v423_v43 = vadd.f32 %v410_v27, %v399_v41  ;;  %v463_v49 = vadd.f32 %v459_v42, %v410_v27 }
 0x1de   : > { %1257 = vpow2.f32 %v1003_v40 }
 0x1df   : > { %v1000_v50 = vmul.f32 -1.442695, %v423_v43  ;;  %v1004_v51 = vmul.f32 -1.442695, %v463_v49 }
 0x1e1   : > { %1259 = vpow2.f32 %v1000_v50 }
 0x1e2   : > { %1261 = vpow2.f32 %v1004_v51  ;;  %v391_v18 = vpop.permute.xlu1 %390 }
 0x1e3   : > { %v400_v20 = vmul.f32 %v391_v18, %v1522_v37  ;;  %v460_v52 = vmul.f32 %v391_v18, %v1528_v39 }
 0x1e5   : > { %v424_v53 = vadd.f32 %v415_v28, %v400_v20  ;;  %v464_v54 = vadd.f32 %v460_v52, %v415_v28 }
 0x1e6   : > { %v396_v56 = vpop.permute.xlu1 %395 }
 0x1e7   : > { %v1256_v55 = vpop.eup %1255  ;;  %v1001_v26 = vmul.f32 -1.442695, %v424_v53  ;;  %v1005_v59 = vmul.f32 -1.442695, %v464_v54  ;;  %v401_v61 = vmul.f32 %v396_v56, %v1519_v36  ;;  %v461_v62 = vmul.f32 %v396_v56, %v1525_v38 }
 0x1e8   : > { %v1258_v25 = vpop.eup %1257  ;;  %v438_v57 = vadd.f32 1.0, %v1256_v55 }
 0x1e9   : > { %v478_v58 = vadd.f32 1.0, %v1258_v25 }
 0x1ea   : > { %1263 = vrcp.f32 %v438_v57 }
 0x1eb   : > { %v1260_v60 = vpop.eup %1259  ;;  %1265 = vrcp.f32 %v478_v58  ;;  %v420_v39 = vpop.permute.xlu1 %419 }
 0x1ec   : > { %v1262_v63 = vpop.eup %1261  ;;  %v439_v37 = vadd.f32 1.0, %v1260_v60  ;;  %1267 = vpow2.f32 %v1001_v26  ;;  %v425_v1 = vadd.f32 %v420_v39, %v401_v61  ;;  %v465_v6 = vadd.f32 %v461_v62, %v420_v39 }
 0x1ed   : > { %v479_v0 = vadd.f32 1.0, %v1262_v63  ;;  %1269 = vpow2.f32 %v1005_v59  ;;  %v256_v59 = vlaneseq }
 0x1ee   : > { %1271 = vrcp.f32 %v439_v37  ;;  %v1002_v9 = vmul.f32 -1.442695, %v425_v1  ;;  %v1006_v12 = vmul.f32 -1.442695, %v465_v6  ;;  %v1246_v37 = vld [vmem:[%s1761_s4 + $0x8] sm:$0xff]  }
 0x1ef   : > { %1273 = vrcp.f32 %v479_v0  ;;  %v257_v60 = vand.u32 127, %v256_v59  ;;  %v260_v59 = vld [vmem:[%s1641_s12] sm:$0xff] }
 0x1f0   : > { %1275 = vpow2.f32 %v1002_v9 }
 0x1f1   : > { %1277 = vpow2.f32 %v1006_v12  ;;  %vm1086_vm1 = vcmp.ne.s32.totalorder %v257_v60, 0  ;;  %vm1087_vm3 = vcmp.ne.s32.totalorder %v257_v60, 127  ;;  %v261_v60 = vld [vmem:[%s1641_s12 + $0x8] sm:$0xff] }
 0x1f2   : > { %vm1591_vm2 = vmpackc.low %vm1086_vm1, %vm1086_vm1 }
 0x1f3   : > { %vm1603_vm4 = vmpackc.low %vm1087_vm3, %vm1087_vm3 }
 0x1f4   : > { %v1264_v13 = vpop.eup %1263 }
 0x1f5   : > { %v1266_v14 = vpop.eup %1265  ;;  %v450_v36 = vmul.f32 %v1264_v13, %v422_v32 }
 0x1f6   : > { %v1268_v15 = vpop.eup %1267  ;;  %v490_v16 = vmul.f32 %v1266_v14, %v462_v33 }
 0x1f7   : > { %v1270_v38 = vpop.eup %1269  ;;  %v440_v17 = vadd.f32 1.0, %v1268_v15 }
 0x1f8   : > { %v1272_v19 = vpop.eup %1271  ;;  %v480_v21 = vadd.f32 1.0, %v1270_v38  ;;  %v494_v27 = vadd.f32 %v490_v16, %v450_v36  ;;  %v310_v36 = vadd.f32 %v1480_v4, %v1482_v5 }
 0x1f9   : > { %v1274_v23 = vpop.eup %1273  ;;  %v451_v24 = vmul.f32 %v1272_v19, %v423_v43  ;;  %1279 = vrcp.f32 %v440_v17 }
 0x1fa   : > { %v491_v28 = vmul.f32 %v1274_v23, %v463_v49  ;;  %1281 = vrcp.f32 %v480_v21  ;;  %v1276_v29 = vpop.eup %1275  ;;  %v498_v40 = vmul.f32 0.5, %v494_v27  ;;  %v1244_v21 = vld [vmem:[%s1760_s3 + $0x8] sm:$0xff]  }
 0x1fb   : > { %v1278_v30 = vpop.eup %1277  ;;  %v441_v34 = vadd.f32 1.0, %v1276_v29 }
 0x1fc   : > { %v495_v31 = vadd.f32 %v491_v28, %v451_v24  ;;  %v481_v35 = vadd.f32 1.0, %v1278_v30 }
 0x1fd   : > { %1283 = vrcp.f32 %v441_v34 }
 0x1fe   : > { %v499_v41 = vmul.f32 0.5, %v495_v31  ;;  %1285 = vrcp.f32 %v481_v35 }
 0x200   : > { %v1189_v32 = vpack.i.bf16 %v499_v41, %v498_v40  ;;  %v518_v33 = vpack.c.bf16 %v499_v41, %v498_v40 }
 0x202   : > { %1190 = vrot.lane.b32.xlu1 %v1189_v32, %s1377_s23 }
 0x203   : > { %v1280_v42 = vpop.eup %1279 }
 0x204   : > { %v1282_v43 = vpop.eup %1281  ;;  %v452_v50 = vmul.f32 %v1280_v42, %v424_v53  ;;  %v1243_v53 = vld [vmem:[%s1760_s3] sm:$0xff]  }
 0x205   : > { %v492_v51 = vmul.f32 %v1282_v43, %v464_v54  ;;  %1116 = vmatprep.mubr.msk.bf16.mxu0 %vm562_vm0, %v1243_v53  ;;  %v1379_v54 = vmov 2  }
 0x206   : > { %1200 = vrot.lane.b32.xlu1 %v1189_v32, %s1378_s25  ;;  %1210 = vset.pattern.permute.xlu0 %v1379_v54 }
 0x207   : > { %v1284_v49 = vpop.eup %1283  ;;  %v496_v52 = vadd.f32 %v492_v51, %v452_v50  ;;  %1209 = vset.pattern.permute.xlu1 %v1379_v54 }
 0x208   : > { %v1286_v18 = vpop.eup %1285  ;;  %v453_v20 = vmul.f32 %v1284_v49, %v425_v1 }
 0x209   : > { %v493_v55 = vmul.f32 %v1286_v18, %v465_v6  ;;  %v500_v25 = vmul.f32 0.5, %v496_v52 }
 0x20a   : > { %537 = vperm.xlu1 %1209, %v1542_v45  }
 0x20b   : > { %v497_v56 = vadd.f32 %v493_v55, %v453_v20 }
 0x20d   : > { %v501_v57 = vmul.f32 0.5, %v497_v56 }
 0x20e   : > { %545 = vperm.xlu1 %1209, %v1555_v48  }
 0x20f   : > { %v1194_v26 = vpack.i.bf16 %v501_v57, %v500_v25  ;;  %v519_v58 = vpack.c.bf16 %v501_v57, %v500_v25 }
 0x211   : > { %1195 = vrot.lane.b32.xlu0 %v1194_v26, %s1377_s23 }
 0x212   : > { %549 = vperm.xlu1 %1209, %v1565_v22  }
 0x215   : > { %1205 = vrot.lane.b32.xlu0 %v1194_v26, %s1378_s25 }
 0x219   : > { %541 = vperm.xlu0 %1210, %v1548_v46  }
 0x21d   : > { %1214 = vset.pattern.permute.xlu0 %v1375_v44 }
 0x274   : > { %v1191_v61 = vpop.permute.xlu1 %1190 }
 0x275   : > { %v1193_v62 = vunpack.i.h.bf16 %v1191_v61  ;;  %v1192_v63 = vunpack.i.l.bf16 %v1191_v61  ;;  %v1381_v61 = vmov 3  }
 0x277   : > { %v1012_v39 = vpack.c.bf16 %v1193_v62, %v1192_v63  ;;  %v262_v62 = vld [vmem:[%s1641_s12 + $0x10] sm:$0xff] }
 0x278   : > { %v1201_v12 = vpop.permute.xlu1 %1200 }
 0x279   : > { %1104 = vmatprep.subr.msk.bf16.mxu0 %vm1591_vm2, %v1012_v39  ;;  %v1203_v13 = vunpack.i.h.bf16 %v1201_v12  ;;  %v1202_v14 = vunpack.i.l.bf16 %v1201_v12 }
 0x27a   : > { %1105 = vmatpush3.bf16.msk.msra.mxu0 %vm1591_vm2, %v1012_v39 }
 0x27b   : > { %v1022_v16 = vpack.c.bf16 %v1203_v13, %v1202_v14 }
 0x283   : > { %v1196_v0 = vpop.permute.xlu0 %1195 }
 0x284   : > { %v1198_v1 = vunpack.i.h.bf16 %v1196_v0  ;;  %v1197_v6 = vunpack.i.l.bf16 %v1196_v0 }
 0x286   : > { %v1017_v9 = vpack.c.bf16 %v1198_v1, %v1197_v6 }
 0x287   : > { %v1206_v15 = vpop.permute.xlu0 %1205 }
 0x288   : > { %1106 = vmatprep.subr.msk.bf16.mxu0 %vm1591_vm2, %v1017_v9  ;;  %v1208_v38 = vunpack.i.h.bf16 %v1206_v15  ;;  %v1207_v17 = vunpack.i.l.bf16 %v1206_v15 }
 0x289   : > { %1107 = vmatpush3.bf16.msk.msra.mxu0 %vm1591_vm2, %v1017_v9  ;;  %v538_v23 = vpop.permute.xlu1 %537 }
 0x28a   : > { %1108 = vmatprep.subr.bf16.mxu0 %v518_v33  ;;  %v1027_v19 = vpack.c.bf16 %v1208_v38, %v1207_v17 }
 0x28d   : > { %1109 = vmatpush3.bf16.msra.mxu0 %v518_v33  ;;  %v546_v24 = vpop.permute.xlu1 %545  ;;  %v1380_v33 = vmov 4  }
 0x28e   : > { %1110 = vmatprep.subr.bf16.mxu0 %v519_v58  ;;  %1211 = vset.pattern.permute.xlu1 %v1380_v33 }
 0x291   : > { %1111 = vmatpush3.bf16.msra.mxu0 %v519_v58  ;;  %v550_v41 = vpop.permute.xlu1 %549 }
 0x292   : > { %1112 = vmatprep.subr.msk.bf16.mxu0 %vm1603_vm4, %v1022_v16 }
 0x295   : > { %1113 = vmatpush3.bf16.msk.msra.mxu0 %vm1603_vm4, %v1022_v16 }
 0x296   : > { %1114 = vmatprep.subr.msk.bf16.mxu0 %vm1603_vm4, %v1027_v19 }
 0x298   : > { %v542_v29 = vpop.permute.xlu0 %541 }
 0x299   : > { %1115 = vmatpush3.bf16.msk.msra.mxu0 %vm1603_vm4, %v1027_v19 }
 0x29c   : > { %1117 = vmatmul.mubr.msk.bf16.vlgmr.msra.gmra.mrb[0].mxu0 %vm562_vm0, %v1244_v21 }
 0x36f   : > { %v1118_v27 = vpop.f32.mrb[0].mxu0 }
 0x370   : > { %v603_v28 = vpop.f32.mrb[1].mxu0  ;;  %v612_v40 = vadd.f32 %v1118_v27, %v546_v24  ;;  %v263_v27 = vld [vmem:[%s1641_s12 + $0x18] sm:$0xff]  ;;  %s1317_s12 = scalar_lea.vmem %s1316_s11, 1024 }
 0x371   : > { %v604_v30 = vadd.f32 %v603_v28, %v538_v23  ;;  %v1119_v31 = vpop.f32.mrb[2].mxu0 }
 0x372   : > { %v606_v34 = vpop.f32.mrb[3].mxu0  ;;  %v615_v32 = vadd.f32 %v1119_v31, %v550_v41 }
 0x373   : > { %v607_v35 = vadd.f32 %v606_v34, %v542_v29  ;;  %618 = vadd.xlane.f32.xlu0 %v604_v30 }
 0x375   : > { %620 = vadd.xlane.f32.xlu1 %v607_v35 }
 0x377   : > { %622 = vadd.xlane.f32.xlu0 %v612_v40 }
 0x37b   : > { %624 = vadd.xlane.f32.xlu0 %v615_v32 }
 0x400   : > { %v619_v42 = vpop.xlane.xlu0 %618 }
 0x401   : > { %v627_v43 = vmul.f32 0.0078125, %v619_v42 }
 0x402   : > { %v621_v50 = vpop.xlane.xlu1 %620 }
 0x403   : > { %v1619_v51 = vsub.f32 %v604_v30, %v627_v43  ;;  %v628_v49 = vmul.f32 0.0078125, %v621_v50 }
 0x404   : > { %v623_v18 = vpop.xlane.xlu0 %622 }
 0x405   : > { %v1621_v20 = vsub.f32 %v607_v35, %v628_v49  ;;  %v629_v52 = vmul.f32 0.0078125, %v623_v18  ;;  %v635_v55 = vmul.f32 %v1619_v51, %v1619_v51 }
 0x407   : > { %v1625_v56 = vsub.f32 %v612_v40, %v629_v52  ;;  %639 = vadd.xlane.f32.xlu1 %v635_v55  ;;  %v636_v25 = vmul.f32 %v1621_v20, %v1621_v20 }
 0x408   : > { %v625_v57 = vpop.xlane.xlu0 %624 }
 0x409   : > { %v630_v26 = vmul.f32 0.0078125, %v625_v57  ;;  %641 = vadd.xlane.f32.xlu0 %v636_v25  ;;  %v637_v58 = vmul.f32 %v1625_v56, %v1625_v56 }
 0x40b   : > { %v1631_v53 = vsub.f32 %v615_v32, %v630_v26  ;;  %643 = vadd.xlane.f32.xlu1 %v637_v58 }
 0x40d   : > { %v638_v54 = vmul.f32 %v1631_v53, %v1631_v53 }
 0x40f   : > { %645 = vadd.xlane.f32.xlu0 %v638_v54 }
 0x41c   : > { %688 = vperm.xlu1 %1211, %v1542_v45  }
 0x420   : > { %692 = vperm.xlu1 %1211, %v1548_v46  }
 0x424   : > { %1212 = vset.pattern.permute.xlu1 %v1376_v47 }
 0x425   : > { %709 = vperm.xlu1 %1212, %v260_v59   ;;  %732 = vperm.xlu0 %1214, %v260_v59  }
 0x429   : > { %714 = vperm.xlu1 %1212, %v261_v60   ;;  %1218 = vset.pattern.permute.xlu0 %v1381_v61 }
 0x42d   : > { %1213 = vset.pattern.permute.xlu1 %v1380_v33 }
 0x42e   : > { %696 = vperm.xlu1 %1213, %v1555_v48  }
 0x432   : > { %700 = vperm.xlu1 %1213, %v1565_v22  }
 0x436   : > { %1215 = vset.pattern.permute.xlu1 %v1375_v44 }
 0x437   : > { %736 = vperm.xlu1 %1215, %v261_v60  }
 0x43b   : > { %1216 = vset.pattern.permute.xlu1 %v1376_v47 }
 0x43c   : > { %719 = vperm.xlu1 %1216, %v262_v62  }
 0x440   : > { %1217 = vset.pattern.permute.xlu1 %v1381_v61 }
 0x494   : > { %v640_v63 = vpop.xlane.xlu1 %639 }
 0x495   : > { %v647_v0 = vmul.f32 0.0078125, %v640_v63 }
 0x496   : > { %v642_v39 = vpop.xlane.xlu0 %641 }
 0x497   : > { %v648_v1 = vmul.f32 0.0078125, %v642_v39  ;;  %v651_v13 = vadd.f32 1e-05, %v647_v0 }
 0x498   : > { %v644_v6 = vpop.xlane.xlu1 %643 }
 0x499   : > { %v652_v9 = vadd.f32 1e-05, %v648_v1  ;;  %v649_v12 = vmul.f32 0.0078125, %v644_v6 }
 0x49b   : > { %1287 = vrsqrt.f32 %v652_v9  ;;  %v653_v14 = vadd.f32 1e-05, %v649_v12 }
 0x49c   : > { %v646_v15 = vpop.xlane.xlu0 %645  ;;  %v689_v31 = vpop.permute.xlu1 %688 }
 0x49d   : > { %1289 = vrsqrt.f32 %v653_v14  ;;  %v650_v16 = vmul.f32 0.0078125, %v646_v15 }
 0x49e   : > { %1291 = vrsqrt.f32 %v651_v13 }
 0x49f   : > { %v654_v38 = vadd.f32 1e-05, %v650_v16 }
 0x4a0   : > { %v693_v34 = vpop.permute.xlu1 %692 }
 0x4a1   : > { %1293 = vrsqrt.f32 %v654_v38 }
 0x4a4   : > { %v710_v35 = vpop.permute.xlu1 %709  ;;  %v733_v42 = vpop.permute.xlu0 %732 }
 0x4a5   : > { %v1288_v17 = vpop.eup %1287 }
 0x4a6   : > { %v660_v19 = vmul.f32 %v1288_v17, %v1548_v46 }
 0x4a7   : > { %v1290_v21 = vpop.eup %1289 }
 0x4a8   : > { %670 = vperm.xlu0 %1218, %v660_v19   ;;  %v661_v23 = vmul.f32 %v1290_v21, %v1555_v48  ;;  %v1292_v24 = vpop.eup %1291  ;;  %v715_v40 = vpop.permute.xlu1 %714 }
 0x4a9   : > { %v659_v28 = vmul.f32 %v1292_v24, %v1542_v45 }
 0x4aa   : > { %675 = vperm.xlu1 %1217, %v661_v23  }
 0x4ab   : > { %v1294_v29 = vpop.eup %1293 }
 0x4ac   : > { %1219 = vset.pattern.permute.xlu0 %v1376_v47  ;;  %v662_v30 = vmul.f32 %v1294_v29, %v1565_v22 }
 0x4ad   : > { %724 = vperm.xlu0 %1219, %v263_v27   ;;  %v697_v41 = vpop.permute.xlu1 %696 }
 0x4ae   : > { %665 = vperm.xlu1 %1217, %v659_v28  }
 0x4b1   : > { %v701_v32 = vpop.permute.xlu1 %700 }
 0x4b2   : > { %680 = vperm.xlu1 %1217, %v662_v30  }
 0x4b6   : > { %1220 = vset.pattern.permute.xlu1 %v1375_v44  ;;  %v737_v33 = vpop.permute.xlu1 %736 }
 0x4b7   : > { %740 = vperm.xlu1 %1220, %v262_v62  }
 0x4bb   : > { %744 = vperm.xlu1 %1220, %v263_v27   ;;  %v720_v43 = vpop.permute.xlu1 %719 }
 0x527   : > { %v671_v47 = vpop.permute.xlu0 %670 }
 0x528   : > { %v684_v50 = vmul.f32 %v671_v47, %v1621_v20 }
 0x529   : > { %v676_v49 = vpop.permute.xlu1 %675 }
 0x52a   : > { %v704_v18 = vadd.f32 %v693_v34, %v684_v50  ;;  %v685_v55 = vmul.f32 %v676_v49, %v1625_v56 }
 0x52c   : > { %v728_v52 = vmul.f32 %v715_v40, %v704_v18  ;;  %v705_v54 = vadd.f32 %v697_v41, %v685_v55  ;;  %v725_v0 = vpop.permute.xlu0 %724 }
 0x52d   : > { %v666_v44 = vpop.permute.xlu1 %665 }
 0x52e   : > { %v748_v25 = vadd.f32 %v737_v33, %v728_v52  ;;  %v683_v57 = vmul.f32 %v666_v44, %v1619_v51  ;;  %v729_v20 = vmul.f32 %v720_v43, %v705_v54  ;;  %v1245_v33 = vld [vmem:[%s1761_s4] sm:$0xff]  }
 0x52f   : > { %1132 = vmatprep.mubr.msk.bf16.mxu1 %vm562_vm0, %v1245_v33 }
 0x530   : > { %v1032_v26 = vmul.f32 -1.442695, %v748_v25  ;;  %v703_v58 = vadd.f32 %v689_v31, %v683_v57 }
 0x531   : > { %v681_v59 = vpop.permute.xlu1 %680 }
 0x532   : > { %1295 = vpow2.f32 %v1032_v26  ;;  %v727_v60 = vmul.f32 %v710_v35, %v703_v58  ;;  %v686_v61 = vmul.f32 %v681_v59, %v1631_v53  ;;  %v311_v59 = vadd.f32 %v1494_v11, %v1488_v8 }
 0x534   : > { %v747_v62 = vadd.f32 %v733_v42, %v727_v60  ;;  %v706_v63 = vadd.f32 %v701_v32, %v686_v61  ;;  %v1382_v42 = vmov 5   ;;  %v309_v61 = vadd.f32 %v1474_v2, %v1476_v3 }
 0x535   : > { %1241 = vset.pattern.permute.xlu0 %v1382_v42  ;;  %1242 = vset.pattern.permute.xlu1 %v1382_v42 }
 0x536   : > { %v1031_v39 = vmul.f32 -1.442695, %v747_v62  ;;  %v741_v1 = vpop.permute.xlu1 %740  ;;  %v730_v56 = vmul.f32 %v725_v0, %v706_v63  ;;  %v313_v0 = vmul.f32 0.5, %v309_v61 }
 0x537   : > { %v749_v6 = vadd.f32 %v741_v1, %v729_v20  ;;  %v315_v20 = vmul.f32 0.5, %v311_v59 }
 0x538   : > { %1297 = vpow2.f32 %v1031_v39 }
 0x539   : > { %v1033_v9 = vmul.f32 -1.442695, %v749_v6 }
 0x53a   : > { %v745_v12 = vpop.permute.xlu1 %744 }
 0x53b   : > { %1299 = vpow2.f32 %v1033_v9  ;;  %v750_v51 = vadd.f32 %v745_v12, %v730_v56 }
 0x53c   : > { %v1296_v13 = vpop.eup %1295 }
 0x53d   : > { %v1034_v14 = vmul.f32 -1.442695, %v750_v51  ;;  %v764_v15 = vadd.f32 1.0, %v1296_v13 }
 0x53f   : > { %1301 = vpow2.f32 %v1034_v14 }
 0x540   : > { %1303 = vrcp.f32 %v764_v15 }
 0x542   : > { %v1298_v16 = vpop.eup %1297 }
 0x543   : > { %v763_v53 = vadd.f32 1.0, %v1298_v16 }
 0x545   : > { %v1300_v38 = vpop.eup %1299  ;;  %1305 = vrcp.f32 %v763_v53 }
 0x546   : > { %v765_v17 = vadd.f32 1.0, %v1300_v38 }
 0x548   : > { %1307 = vrcp.f32 %v765_v17 }
 0x549   : > { %v1302_v19 = vpop.eup %1301 }
 0x54a   : > { %v766_v21 = vadd.f32 1.0, %v1302_v19  ;;  %v1304_v23 = vpop.eup %1303 }
 0x54b   : > { %v776_v28 = vmul.f32 %v1304_v23, %v748_v25 }
 0x54c   : > { %1309 = vrcp.f32 %v766_v21 }
 0x54f   : > { %v1306_v24 = vpop.eup %1305 }
 0x550   : > { %v775_v27 = vmul.f32 %v1306_v24, %v747_v62  ;;  %v312_v62 = vadd.f32 %v1492_v10, %v1486_v7  ;;  %v314_v7 = vmul.f32 0.5, %v310_v36 }
 0x552   : > { %v1221_v29 = vpack.i.bf16 %v776_v28, %v775_v27  ;;  %v793_v30 = vpack.c.bf16 %v776_v28, %v775_v27  ;;  %v1308_v31 = vpop.eup %1307  ;;  %v316_v8 = vmul.f32 0.5, %v312_v62 }
 0x553   : > { %v777_v35 = vmul.f32 %v1308_v31, %v749_v6 }
 0x554   : > { %1222 = vrot.lane.b32.xlu0 %v1221_v29, %s1377_s23 }
 0x556   : > { %v1310_v34 = vpop.eup %1309 }
 0x557   : > { %v778_v40 = vmul.f32 %v1310_v34, %v750_v51 }
 0x558   : > { %1232 = vrot.lane.b32.xlu0 %v1221_v29, %s1378_s25 }
 0x559   : > { %v1226_v41 = vpack.i.bf16 %v778_v40, %v777_v35  ;;  %v794_v32 = vpack.c.bf16 %v778_v40, %v777_v35 }
 0x55b   : > { %1227 = vrot.lane.b32.xlu1 %v1226_v41, %s1377_s23  ;;  %s912_s23 = sshll.u32 %s232_s17, 4  ;;  %s1707_s23 = int_to_ptr.vmem [resolvable:$true] %s912_s23 }
 0x55c   : > { %810 = vperm.xlu0 %1241, %v1542_v45   ;;  %s1311_s9 = scalar_lea.vmem %s1707_s23, 512  ;;  %p1318_p0 = scmp.lt.s32.totalorder %s1707_s23, %s1316_s11 }
 0x55d   : > { %p1312_p11 = scmp.ne.s32.totalorder %s1707_s23, %s1311_s9  ;;  %p1319_p1 = scmp.lt.s32.totalorder %s1317_s12, %s1311_s9 }
 0x55f   : > { %1237 = vrot.lane.b32.xlu1 %v1226_v41, %s1378_s25  ;;  %s1066_s25 = sshll.u32 %s1437_s22, 9  ;;  %s1716_s22 = scalar_lea.sflag [#allocation3], %s230_s15 }
 0x560   : > { %822 = vperm.xlu0 %1241, %v1565_v22   ;;  %s1712_s8 = scalar_lea.hbm %s1762_s5, %s1066_s25  ;;  %p1313_p12 = pnand %p1312_p11, %p1454_p5 }
 0x561   : > { %p1320_p2 = por %p1319_p1, %p1318_p0 }
 0x562   : > { %p1314_p13 = pneg %p1313_p12 }
 0x563   : > { %814 = vperm.xlu1 %1242, %v1548_v46  }
 0x564   : > { %p1321_p3 = pnand %p1320_p2, %p1314_p13 }
 0x567   : > { %818 = vperm.xlu1 %1242, %v1555_v48  }
 0x5c6   : > { %v1223_v43 = vpop.permute.xlu0 %1222 }
 0x5c7   : > { %v1225_v47 = vunpack.i.h.bf16 %v1223_v43  ;;  %v1224_v50 = vunpack.i.l.bf16 %v1223_v43 }
 0x5c9   : > { %v1040_v49 = vpack.c.bf16 %v1225_v47, %v1224_v50 }
 0x5ca   : > { %v1233_v46 = vpop.permute.xlu0 %1232 }
 0x5cb   : > { %1120 = vmatprep.subr.msk.bf16.mxu1 %vm1591_vm2, %v1040_v49  ;;  %v1235_v48 = vunpack.i.h.bf16 %v1233_v46  ;;  %v1234_v22 = vunpack.i.l.bf16 %v1233_v46 }
 0x5cc   : > { %1121 = vmatpush3.bf16.msk.msra.mxu1 %vm1591_vm2, %v1040_v49 }
 0x5cd   : > { %v1228_v18 = vpop.permute.xlu1 %1227  ;;  %v1050_v25 = vpack.c.bf16 %v1235_v48, %v1234_v22 }
 0x5ce   : > { %v1230_v52 = vunpack.i.h.bf16 %v1228_v18  ;;  %v1229_v55 = vunpack.i.l.bf16 %v1228_v18 }
 0x5d0   : > { %v1045_v45 = vpack.c.bf16 %v1230_v52, %v1229_v55 }
 0x5d1   : > { %v1238_v44 = vpop.permute.xlu1 %1237 }
 0x5d2   : > { %1122 = vmatprep.subr.msk.bf16.mxu1 %vm1591_vm2, %v1045_v45  ;;  %v1240_v57 = vunpack.i.h.bf16 %v1238_v44  ;;  %v1239_v26 = vunpack.i.l.bf16 %v1238_v44 }
 0x5d3   : > { %1123 = vmatpush3.bf16.msk.msra.mxu1 %vm1591_vm2, %v1045_v45 }
 0x5d4   : > { %1124 = vmatprep.subr.bf16.mxu1 %v793_v30  ;;  %v1055_v58 = vpack.c.bf16 %v1240_v57, %v1239_v26 }
 0x5d7   : > { %1125 = vmatpush3.bf16.msra.mxu1 %v793_v30 }
 0x5d8   : > { %1126 = vmatprep.subr.bf16.mxu1 %v794_v32 }
 0x5db   : > { %1127 = vmatpush3.bf16.msra.mxu1 %v794_v32  ;;  %v811_v60 = vpop.permute.xlu0 %810 }
 0x5dc   : > { %1128 = vmatprep.subr.msk.bf16.mxu1 %vm1603_vm4, %v1050_v25 }
 0x5df   : > { %1129 = vmatpush3.bf16.msk.msra.mxu1 %vm1603_vm4, %v1050_v25  ;;  %v823_v11 = vpop.permute.xlu0 %822 }
 0x5e0   : > { %1130 = vmatprep.subr.msk.bf16.mxu1 %vm1603_vm4, %v1055_v58 }
 0x5e2   : > { %v815_v54 = vpop.permute.xlu1 %814 }
 0x5e3   : > { %1131 = vmatpush3.bf16.msk.msra.mxu1 %vm1603_vm4, %v1055_v58 }
 0x5e6   : > { %1133 = vmatmul.mubr.msk.bf16.vlgmr.msra.gmra.mrb[0].mxu1 %vm562_vm0, %v1246_v37  ;;  %v819_v63 = vpop.permute.xlu1 %818 }
 0x6b9   : > { %v1134_v39 = vpop.f32.mrb[0].mxu1 }
 0x6ba   : > { %v884_v1 = vadd.f32 %v1134_v39, %v819_v63  ;;  %v875_v6 = vpop.f32.mrb[1].mxu1 }
 0x6bb   : > { %v876_v2 = vadd.f32 %v875_v6, %v811_v60  ;;  %v1135_v3 = vpop.f32.mrb[2].mxu1 }
 0x6bc   : > { %v892_v10 = vadd.f32 %v884_v1, %v315_v20  ;;  %v887_v56 = vadd.f32 %v1135_v3, %v823_v11  ;;  %v878_v9 = vpop.f32.mrb[3].mxu1 }
 0x6bd   : > { %v890_v4 = vadd.f32 %v876_v2, %v313_v0  ;;  %v879_v5 = vadd.f32 %v878_v9, %v815_v54 }
 0x6be   : > { %896 = vst [vmem:[%s232_s17 + $0x10] sm:$0xff] %v892_v10  ;;  %v893_v12 = vadd.f32 %v887_v56, %v316_v8 }
 0x6bf   : > { %894 = vst [vmem:[%s232_s17] sm:$0xff] %v890_v4  ;;  %v891_v51 = vadd.f32 %v879_v5, %v314_v7 }
 0x6c0   : > { %897 = vst [vmem:[%s232_s17 + $0x18] sm:$0xff] %v893_v12 }
 0x6c1   : > { %895 = vst [vmem:[%s232_s17 + $0x8] sm:$0xff] %v891_v51 }
 0x6c2   : > { %1324 = shalt.err (!%p1321_p3)
}
 0x6c3   : > { %s1325_s30 = scalar_lea.hbm %s1712_s8, 512  ;;  %s1329_s14 = scalar_lea.hbm %s1762_s5, 1024 }
 0x6c4   : > { %p1326_p4 = scmp.ne.s32.totalorder %s1712_s8, %s1325_s30  ;;  %p1330_p9 = scmp.lt.u32.totalorder %s1712_s8, %s1762_s5 }
 0x6c5   : > { %p1331_p10 = scmp.lt.u32.totalorder %s1329_s14, %s1325_s30  ;;  %p1333_p12 = scmp.lt.u32.totalorder %s1325_s30, %s1712_s8 }
 0x6c6   : > { %p1327_p7 = pnand %p1326_p4, %p1454_p5 }
 0x6c7   : > { %p1332_p11 = por %p1331_p10, %p1330_p9 }
 0x6c8   : > { %p1328_p8 = pneg %p1327_p7 }
 0x6c9   : > { %p1334_p13 = por %p1333_p12, %p1332_p11 }
 0x6cb   : > { %p1335_p0 = pnand %p1334_p13, %p1328_p8 }
 0x6cd   : > { %1338 = shalt.err (!%p1335_p0)
}
 0x6ce   : > { %s1384_s17 = smov 128   ;;  %s1385_s25 = smov 8  }
 0x6cf   : > { %1136 = dma.vmem_to_hbm [thread:$0]  (%p1454_p5), %s1707_s23, 512, %s1712_s8, %s1716_s22, %s1384_s17, %s1384_s17, %s1385_s25  }
 0x6d0 PF: > { %p1142_p1 = scmp.ge.s32.totalorder %s1373_s21, 2  ;;  %s927_s26 = sand.u32 1, %s1361_s18  }
 0x6d1   : > { %s928_s7 = scalar_lea.sflag [#allocation3], %s927_s26 }
 0x6d2   : > { %p1139_p2 = pnand %p1142_p1, %p1458_p6 }
 0x6d4   : > { %1356 = dma.done.wait (!%p1139_p2), %s928_s7, 512  }
 0x6d5   : > { %1358 = vsyncadd (!%p1139_p2), %s928_s7, 4294966784  ;;  %p15_p3 = scmp.ge.s32.totalorder %s1441_s24, 4   ;;  %s1769_s18 = smov %s1365_s19 }
 0x6d6   : > { %s1770_s19 = smov %s1369_s20  ;;  %s1771_s20 = smov %s1452_s27 }
 0x6d7   : > { %s1772_s21 = smov %s1441_s24  ;;  %17 = sbr.rel (!%p15_p3) target bundleno = 3 (0x3), region = 79 }
 0x6de   :  { %933 = vsyncpa [#allocation3], 1 }
 0x6df   :  { %935 = vsyncpa [#allocation3 + $0x1], 1 }

// kernel: tpu_custom_call.1
= control target key start
LH: loop header
LB: loop body
LE: loop exit
PB: predicated region body
PF: predicated region fallthrough
CT: control target
= control target key end

     0   :  { %10 = vsyncpa [#allocation3], 0  ;;  %s1757_s0 = inlined_call_operand.vmem [shape: bf16[2,2,32,128], index: 0, kind: input, shape index: {}]   ;;  %s1758_s1 = inlined_call_operand.vmem [shape: f32[2,32,2], index: 1, kind: input, shape index: {}]   ;;  %s1759_s2 = inlined_call_operand.vmem [shape: f32[32,6], index: 2, kind: input, shape index: {}]   ;;  %s1760_s3 = inlined_call_operand.vmem [shape: bf16[32,96], index: 3, kind: input, shape index: {}]   ;;  %s1761_s4 = inlined_call_operand.vmem [shape: bf16[32,96], index: 4, kind: input, shape index: {}]   ;;  %s1762_s5 = inlined_call_operand.hbm [shape: f32[2,32,128], index: 5, kind: output, shape index: {}]  }
   0x1   :  { %12 = vsyncpa [#allocation3 + $0x1], 0  ;;  %s1416_s18 = smov 0   ;;  %s1418_s19 = smov 0  }
   0x2   :  { %s1420_s20 = smov 0   ;;  %s1422_s21 = smov 0  }
   0x3 LB: > { %s1437_s22 = sadd.s32 4294967295, %s1373_s21   ;;  %s986_s23 = sadd.s32 4294967294, %s1373_s21   ;;  %s1373_s21 = sphi %s1422_s21, %s1772_s21   ;;  %s1369_s20 = sphi %s1420_s20, %s1771_s20   ;;  %s1365_s19 = sphi %s1418_s19, %s1770_s19   ;;  %s1361_s18 = sphi %s1416_s18, %s1769_s18  }
   0x4   : > { %s1441_s24 = sadd.s32 1, %s1373_s21   ;;  %s140_s25 = sadd.s32 1, %s1369_s20 }
   0x5   : > { %s137_s26 = ssub.s32 %s1373_s21, %s1441_s24  ;;  %p150_p0 = scmp.ne.s32.totalorder %s1369_s20, %s1365_s19 }
   0x6   : > { %p138_p1 = scmp.eq.s32.totalorder %s137_s26, 0  ;;  %p151_p2 = scmp.eq.s32.totalorder %s1437_s22, 1 }
   0x7   : > { %p156_p3 = scmp.ne.s32.totalorder %s1365_s19, %s1361_s18  ;;  %p157_p4 = scmp.eq.s32.totalorder %s986_s23, 1 }
   0x8   : > { %s1452_s27 = scalar_select %p138_p1, %s1369_s20, %s140_s25  }
   0x9   : > { %p1454_p5 = por %p151_p2, %p150_p0  ;;  %p1458_p6 = por %p157_p4, %p156_p3 }
   0xa   : > { %p989_p7 = scmp.ge.s32.totalorder %s1373_s21, 1  ;;  %p200_p8 = scmp.lt.s32.totalorder %s1373_s21, 3 }
   0xc   : > { %p201_p9 = pnand %p989_p7, %p200_p8 }
   0xd   : > { %p233_p10 = scmp.lt.s32.totalorder (!%p201_p9), %s1437_s22, 1  ;;  %v1375_v44 = vmov (!%p201_p9), 1   ;;  %v1542_v45 = vld [vmem:[%s1759_s2] sm:$0xff] (!%p201_p9)  ;;  %v1548_v46 = vld [vmem:[%s1759_s2 + $0x8] sm:$0xff] (!%p201_p9)  ;;  %v1376_v47 = vmov (!%p201_p9), 0   ;;  %v1555_v48 = vld [vmem:[%s1759_s2 + $0x10] sm:$0xff] (!%p201_p9) }
   0xe   : > { %204 = sbr.rel (%p201_p9) target bundleno = 1744 (0x6d0), region = 40  ;;  %1186 = vset.pattern.permute.xlu1 (!%p201_p9), %v1375_v44  ;;  %1185 = vset.pattern.permute.xlu0 (!%p201_p9), %v1376_v47  ;;  %s1377_s23 = smov (!%p201_p9), 1   ;;  %vm562_vm0 = vcmask (!%p201_p9), 785408  }
   0xf   : > { %s1378_s25 = smov (!%p201_p9), 127   ;;  %s230_s15 = sand.u32 (!%p201_p9), 1, %s1365_s19  }
  0x10   : > { %s990_s16 = sshll.u32 (!%p201_p9), %s230_s15, 5  ;;  %s1383_s10 = smov (!%p201_p9), [#allocation2]  }
  0x11   : > { %s232_s17 = scalar_lea.vmem (!%p201_p9), [#allocation2], %s990_s16  ;;  %s1315_s11 = sshll.u32 (!%p201_p9), %s1383_s10, 4  ;;  %s1316_s11 = int_to_ptr.vmem [resolvable:$false] %s1315_s11 }
  0x15   : > { %s1466_s30 = scalar_select %p233_p10, %s1437_s22, 1 }
  0x17   : > { %s1064_s6 = sshll.u32 %s1466_s30, 5 }
  0x18   : > { %s237_s9 = scalar_lea.vmem %s1757_s0, %s1064_s6  ;;  %s1641_s12 = scalar_lea.vmem %s1758_s1, %s1064_s6 }
  0x19   : > { %v1084_v0 = vld [vmem:[%s237_s9 + $0x10] sm:$0xff]   ;;  %v1068_v1 = vld [vmem:[%s237_s9] sm:$0xff]   ;;  %v1083_v6 = vld [vmem:[%s237_s9 + $0x8] sm:$0xff]  }
  0x1a   : > { %v1474_v2 = vunpack.c.l.bf16 %v1084_v0  ;;  %v1476_v3 = vunpack.c.l.bf16 %v1068_v1  ;;  %v1480_v4 = vunpack.c.h.bf16 %v1084_v0  ;;  %v1482_v5 = vunpack.c.h.bf16 %v1068_v1  ;;  %v1085_v9 = vld [vmem:[%s237_s9 + $0x18] sm:$0xff]  }
  0x1b   : > { %v1486_v7 = vunpack.c.h.bf16 %v1083_v6  ;;  %v1488_v8 = vunpack.c.l.bf16 %v1083_v6  ;;  %v1492_v10 = vunpack.c.h.bf16 %v1085_v9  ;;  %v1494_v11 = vunpack.c.l.bf16 %v1085_v9 }
  0x1c   : > { %297 = vadd.xlane.f32.xlu1 %v1474_v2  ;;  %272 = vadd.xlane.f32.xlu0 %v1476_v3 }
  0x20   : > { %299 = vadd.xlane.f32.xlu1 %v1480_v4  ;;  %274 = vadd.xlane.f32.xlu0 %v1482_v5 }
  0x24   : > { %278 = vadd.xlane.f32.xlu1 %v1486_v7  ;;  %276 = vadd.xlane.f32.xlu0 %v1488_v8 }
  0x28   : > { %303 = vadd.xlane.f32.xlu1 %v1492_v10  ;;  %301 = vadd.xlane.f32.xlu0 %v1494_v11 }
  0xa9   : > { %v298_v12 = vpop.xlane.xlu1 %297  ;;  %v273_v13 = vpop.xlane.xlu0 %272 }
  0xaa   : > { %v305_v14 = vadd.f32 %v298_v12, %v273_v13 }
  0xac   : > { %v318_v15 = vmul.f32 0.00390625, %v305_v14 }
  0xad   : > { %v300_v16 = vpop.xlane.xlu1 %299  ;;  %v275_v17 = vpop.xlane.xlu0 %274 }
  0xae   : > { %v1499_v18 = vsub.f32 %v1476_v3, %v318_v15  ;;  %v306_v19 = vadd.f32 %v300_v16, %v275_v17  ;;  %v1502_v20 = vsub.f32 %v1474_v2, %v318_v15 }
  0xb0   : > { %v319_v21 = vmul.f32 0.00390625, %v306_v19  ;;  %v326_v22 = vmul.f32 %v1499_v18, %v1499_v18  ;;  %v346_v27 = vmul.f32 %v1502_v20, %v1502_v20 }
  0xb1   : > { %v279_v23 = vpop.xlane.xlu1 %278  ;;  %v277_v24 = vpop.xlane.xlu0 %276 }
  0xb2   : > { %v1507_v25 = vsub.f32 %v1482_v5, %v319_v21  ;;  %330 = vadd.xlane.f32.xlu0 %v326_v22  ;;  %v1510_v26 = vsub.f32 %v1480_v4, %v319_v21  ;;  %v1565_v22 = vld [vmem:[%s1759_s2 + $0x18] sm:$0xff] }
  0xb4   : > { %v327_v28 = vmul.f32 %v1507_v25, %v1507_v25  ;;  %v347_v35 = vmul.f32 %v1510_v26, %v1510_v26 }
  0xb5   : > { %v304_v29 = vpop.xlane.xlu1 %303  ;;  %v302_v30 = vpop.xlane.xlu0 %301 }
  0xb6   : > { %v308_v31 = vadd.f32 %v304_v29, %v279_v23  ;;  %v307_v32 = vadd.f32 %v302_v30, %v277_v24  ;;  %350 = vadd.xlane.f32.xlu0 %v346_v27  ;;  %332 = vadd.xlane.f32.xlu1 %v327_v28 }
  0xb8   : > { %v321_v33 = vmul.f32 0.00390625, %v308_v31  ;;  %v320_v34 = vmul.f32 0.00390625, %v307_v32 }
  0xba   : > { %v1519_v36 = vsub.f32 %v1486_v7, %v321_v33  ;;  %v1522_v37 = vsub.f32 %v1488_v8, %v320_v34  ;;  %352 = vadd.xlane.f32.xlu1 %v347_v35  ;;  %v1525_v38 = vsub.f32 %v1492_v10, %v321_v33  ;;  %v1528_v39 = vsub.f32 %v1494_v11, %v320_v34 }
  0xbc   : > { %v329_v40 = vmul.f32 %v1519_v36, %v1519_v36  ;;  %v328_v41 = vmul.f32 %v1522_v37, %v1522_v37  ;;  %v349_v42 = vmul.f32 %v1525_v38, %v1525_v38  ;;  %v348_v43 = vmul.f32 %v1528_v39, %v1528_v39 }
  0xbe   : > { %336 = vadd.xlane.f32.xlu1 %v329_v40  ;;  %334 = vadd.xlane.f32.xlu0 %v328_v41 }
  0xc2   : > { %356 = vadd.xlane.f32.xlu1 %v349_v42  ;;  %354 = vadd.xlane.f32.xlu0 %v348_v43 }
  0xd3   : > { %404 = vperm.xlu1 %1186, %v1542_v45  }
  0xd7   : > { %409 = vperm.xlu1 %1186, %v1548_v46  }
  0xdb   : > { %414 = vperm.xlu1 %1186, %v1555_v48  }
  0xdf   : > { %1187 = vset.pattern.permute.xlu1 %v1376_v47 }
 0x13f   : > { %v331_v49 = vpop.xlane.xlu0 %330 }
 0x143   : > { %v333_v50 = vpop.xlane.xlu1 %332  ;;  %v351_v51 = vpop.xlane.xlu0 %350 }
 0x144   : > { %v358_v52 = vadd.f32 %v351_v51, %v331_v49 }
 0x146   : > { %v362_v53 = vmul.f32 0.00390625, %v358_v52 }
 0x147   : > { %v353_v54 = vpop.xlane.xlu1 %352 }
 0x148   : > { %v366_v55 = vadd.f32 1e-05, %v362_v53  ;;  %v359_v56 = vadd.f32 %v353_v54, %v333_v50 }
 0x14a   : > { %1247 = vrsqrt.f32 %v366_v55  ;;  %v363_v57 = vmul.f32 0.00390625, %v359_v56 }
 0x14b   : > { %v337_v58 = vpop.xlane.xlu1 %336  ;;  %v335_v59 = vpop.xlane.xlu0 %334 }
 0x14c   : > { %v367_v60 = vadd.f32 1e-05, %v363_v57 }
 0x14e   : > { %1249 = vrsqrt.f32 %v367_v60 }
 0x14f   : > { %v357_v61 = vpop.xlane.xlu1 %356  ;;  %v355_v62 = vpop.xlane.xlu0 %354 }
 0x150   : > { %v361_v63 = vadd.f32 %v357_v61, %v337_v58  ;;  %v360_v0 = vadd.f32 %v355_v62, %v335_v59 }
 0x152   : > { %v365_v1 = vmul.f32 0.00390625, %v361_v63  ;;  %v364_v6 = vmul.f32 0.00390625, %v360_v0 }
 0x153   : > { %v405_v24 = vpop.permute.xlu1 %404 }
 0x154   : > { %v1248_v9 = vpop.eup %1247  ;;  %v368_v12 = vadd.f32 1e-05, %v364_v6  ;;  %v369_v13 = vadd.f32 1e-05, %v365_v1 }
 0x155   : > { %v374_v14 = vmul.f32 %v1248_v9, %v1542_v45 }
 0x156   : > { %1251 = vrsqrt.f32 %v368_v12 }
 0x157   : > { %380 = vperm.xlu0 %1185, %v374_v14   ;;  %1253 = vrsqrt.f32 %v369_v13  ;;  %v410_v27 = vpop.permute.xlu1 %409 }
 0x158   : > { %v1250_v15 = vpop.eup %1249 }
 0x159   : > { %v375_v16 = vmul.f32 %v1250_v15, %v1548_v46 }
 0x15b   : > { %385 = vperm.xlu1 %1187, %v375_v16   ;;  %v415_v28 = vpop.permute.xlu1 %414 }
 0x160   : > { %v1252_v17 = vpop.eup %1251 }
 0x161   : > { %v376_v19 = vmul.f32 %v1252_v17, %v1555_v48  ;;  %v1254_v21 = vpop.eup %1253 }
 0x162   : > { %v377_v23 = vmul.f32 %v1254_v21, %v1565_v22 }
 0x163   : > { %390 = vperm.xlu1 %1187, %v376_v19  }
 0x167   : > { %395 = vperm.xlu1 %1187, %v377_v23  }
 0x16b   : > { %1188 = vset.pattern.permute.xlu1 %v1375_v44 }
 0x16c   : > { %419 = vperm.xlu1 %1188, %v1565_v22  }
 0x1d6   : > { %v381_v29 = vpop.permute.xlu0 %380 }
 0x1d7   : > { %v398_v30 = vmul.f32 %v381_v29, %v1499_v18  ;;  %v458_v31 = vmul.f32 %v381_v29, %v1502_v20 }
 0x1d9   : > { %v422_v32 = vadd.f32 %v405_v24, %v398_v30  ;;  %v462_v33 = vadd.f32 %v458_v31, %v405_v24 }
 0x1da   : > { %v386_v34 = vpop.permute.xlu1 %385 }
 0x1db   : > { %v999_v35 = vmul.f32 -1.442695, %v422_v32  ;;  %v1003_v40 = vmul.f32 -1.442695, %v462_v33  ;;  %v399_v41 = vmul.f32 %v386_v34, %v1507_v25  ;;  %v459_v42 = vmul.f32 %v386_v34, %v1510_v26 }
 0x1dd   : > { %1255 = vpow2.f32 %v999_v35  ;;  %v423_v43 = vadd.f32 %v410_v27, %v399_v41  ;;  %v463_v49 = vadd.f32 %v459_v42, %v410_v27 }
 0x1de   : > { %1257 = vpow2.f32 %v1003_v40 }
 0x1df   : > { %v1000_v50 = vmul.f32 -1.442695, %v423_v43  ;;  %v1004_v51 = vmul.f32 -1.442695, %v463_v49 }
 0x1e1   : > { %1259 = vpow2.f32 %v1000_v50 }
 0x1e2   : > { %1261 = vpow2.f32 %v1004_v51  ;;  %v391_v18 = vpop.permute.xlu1 %390 }
 0x1e3   : > { %v400_v20 = vmul.f32 %v391_v18, %v1522_v37  ;;  %v460_v52 = vmul.f32 %v391_v18, %v1528_v39 }
 0x1e5   : > { %v424_v53 = vadd.f32 %v415_v28, %v400_v20  ;;  %v464_v54 = vadd.f32 %v460_v52, %v415_v28 }
 0x1e6   : > { %v396_v56 = vpop.permute.xlu1 %395 }
 0x1e7   : > { %v1256_v55 = vpop.eup %1255  ;;  %v1001_v26 = vmul.f32 -1.442695, %v424_v53  ;;  %v1005_v59 = vmul.f32 -1.442695, %v464_v54  ;;  %v401_v61 = vmul.f32 %v396_v56, %v1519_v36  ;;  %v461_v62 = vmul.f32 %v396_v56, %v1525_v38 }
 0x1e8   : > { %v1258_v25 = vpop.eup %1257  ;;  %v438_v57 = vadd.f32 1.0, %v1256_v55 }
 0x1e9   : > { %v478_v58 = vadd.f32 1.0, %v1258_v25 }
 0x1ea   : > { %1263 = vrcp.f32 %v438_v57 }
 0x1eb   : > { %v1260_v60 = vpop.eup %1259  ;;  %1265 = vrcp.f32 %v478_v58  ;;  %v420_v39 = vpop.permute.xlu1 %419 }
 0x1ec   : > { %v1262_v63 = vpop.eup %1261  ;;  %v439_v37 = vadd.f32 1.0, %v1260_v60  ;;  %1267 = vpow2.f32 %v1001_v26  ;;  %v425_v1 = vadd.f32 %v420_v39, %v401_v61  ;;  %v465_v6 = vadd.f32 %v461_v62, %v420_v39 }
 0x1ed   : > { %v479_v0 = vadd.f32 1.0, %v1262_v63  ;;  %1269 = vpow2.f32 %v1005_v59  ;;  %v256_v59 = vlaneseq }
 0x1ee   : > { %1271 = vrcp.f32 %v439_v37  ;;  %v1002_v9 = vmul.f32 -1.442695, %v425_v1  ;;  %v1006_v12 = vmul.f32 -1.442695, %v465_v6  ;;  %v1246_v37 = vld [vmem:[%s1761_s4 + $0x8] sm:$0xff]  }
 0x1ef   : > { %1273 = vrcp.f32 %v479_v0  ;;  %v257_v60 = vand.u32 127, %v256_v59  ;;  %v260_v59 = vld [vmem:[%s1641_s12] sm:$0xff] }
 0x1f0   : > { %1275 = vpow2.f32 %v1002_v9 }
 0x1f1   : > { %1277 = vpow2.f32 %v1006_v12  ;;  %vm1086_vm1 = vcmp.ne.s32.totalorder %v257_v60, 0  ;;  %vm1087_vm3 = vcmp.ne.s32.totalorder %v257_v60, 127  ;;  %v261_v60 = vld [vmem:[%s1641_s12 + $0x8] sm:$0xff] }
 0x1f2   : > { %vm1591_vm2 = vmpackc.low %vm1086_vm1, %vm1086_vm1 }
 0x1f3   : > { %vm1603_vm4 = vmpackc.low %vm1087_vm3, %vm1087_vm3 }
 0x1f4   : > { %v1264_v13 = vpop.eup %1263 }
 0x1f5   : > { %v1266_v14 = vpop.eup %1265  ;;  %v450_v36 = vmul.f32 %v1264_v13, %v422_v32 }
 0x1f6   : > { %v1268_v15 = vpop.eup %1267  ;;  %v490_v16 = vmul.f32 %v1266_v14, %v462_v33 }
 0x1f7   : > { %v1270_v38 = vpop.eup %1269  ;;  %v440_v17 = vadd.f32 1.0, %v1268_v15 }
 0x1f8   : > { %v1272_v19 = vpop.eup %1271  ;;  %v480_v21 = vadd.f32 1.0, %v1270_v38  ;;  %v494_v27 = vadd.f32 %v490_v16, %v450_v36  ;;  %v310_v36 = vadd.f32 %v1480_v4, %v1482_v5 }
 0x1f9   : > { %v1274_v23 = vpop.eup %1273  ;;  %v451_v24 = vmul.f32 %v1272_v19, %v423_v43  ;;  %1279 = vrcp.f32 %v440_v17 }
 0x1fa   : > { %v491_v28 = vmul.f32 %v1274_v23, %v463_v49  ;;  %1281 = vrcp.f32 %v480_v21  ;;  %v1276_v29 = vpop.eup %1275  ;;  %v498_v40 = vmul.f32 0.5, %v494_v27  ;;  %v1244_v21 = vld [vmem:[%s1760_s3 + $0x8] sm:$0xff]  }
 0x1fb   : > { %v1278_v30 = vpop.eup %1277  ;;  %v441_v34 = vadd.f32 1.0, %v1276_v29 }
 0x1fc   : > { %v495_v31 = vadd.f32 %v491_v28, %v451_v24  ;;  %v481_v35 = vadd.f32 1.0, %v1278_v30 }
 0x1fd   : > { %1283 = vrcp.f32 %v441_v34 }
 0x1fe   : > { %v499_v41 = vmul.f32 0.5, %v495_v31  ;;  %1285 = vrcp.f32 %v481_v35 }
 0x200   : > { %v1189_v32 = vpack.i.bf16 %v499_v41, %v498_v40  ;;  %v518_v33 = vpack.c.bf16 %v499_v41, %v498_v40 }
 0x202   : > { %1190 = vrot.lane.b32.xlu1 %v1189_v32, %s1377_s23 }
 0x203   : > { %v1280_v42 = vpop.eup %1279 }
 0x204   : > { %v1282_v43 = vpop.eup %1281  ;;  %v452_v50 = vmul.f32 %v1280_v42, %v424_v53  ;;  %v1243_v53 = vld [vmem:[%s1760_s3] sm:$0xff]  }
 0x205   : > { %v492_v51 = vmul.f32 %v1282_v43, %v464_v54  ;;  %1116 = vmatprep.mubr.msk.bf16.mxu0 %vm562_vm0, %v1243_v53  ;;  %v1379_v54 = vmov 2  }
 0x206   : > { %1200 = vrot.lane.b32.xlu1 %v1189_v32, %s1378_s25  ;;  %1210 = vset.pattern.permute.xlu0 %v1379_v54 }
 0x207   : > { %v1284_v49 = vpop.eup %1283  ;;  %v496_v52 = vadd.f32 %v492_v51, %v452_v50  ;;  %1209 = vset.pattern.permute.xlu1 %v1379_v54 }
 0x208   : > { %v1286_v18 = vpop.eup %1285  ;;  %v453_v20 = vmul.f32 %v1284_v49, %v425_v1 }
 0x209   : > { %v493_v55 = vmul.f32 %v1286_v18, %v465_v6  ;;  %v500_v25 = vmul.f32 0.5, %v496_v52 }
 0x20a   : > { %537 = vperm.xlu1 %1209, %v1542_v45  }
 0x20b   : > { %v497_v56 = vadd.f32 %v493_v55, %v453_v20 }
 0x20d   : > { %v501_v57 = vmul.f32 0.5, %v497_v56 }
 0x20e   : > { %545 = vperm.xlu1 %1209, %v1555_v48  }
 0x20f   : > { %v1194_v26 = vpack.i.bf16 %v501_v57, %v500_v25  ;;  %v519_v58 = vpack.c.bf16 %v501_v57, %v500_v25 }
 0x211   : > { %1195 = vrot.lane.b32.xlu0 %v1194_v26, %s1377_s23 }
 0x212   : > { %549 = vperm.xlu1 %1209, %v1565_v22  }
 0x215   : > { %1205 = vrot.lane.b32.xlu0 %v1194_v26, %s1378_s25 }
 0x219   : > { %541 = vperm.xlu0 %1210, %v1548_v46  }
 0x21d   : > { %1214 = vset.pattern.permute.xlu0 %v1375_v44 }
 0x274   : > { %v1191_v61 = vpop.permute.xlu1 %1190 }
 0x275   : > { %v1193_v62 = vunpack.i.h.bf16 %v1191_v61  ;;  %v1192_v63 = vunpack.i.l.bf16 %v1191_v61  ;;  %v1381_v61 = vmov 3  }
 0x277   : > { %v1012_v39 = vpack.c.bf16 %v1193_v62, %v1192_v63  ;;  %v262_v62 = vld [vmem:[%s1641_s12 + $0x10] sm:$0xff] }
 0x278   : > { %v1201_v12 = vpop.permute.xlu1 %1200 }
 0x279   : > { %1104 = vmatprep.subr.msk.bf16.mxu0 %vm1591_vm2, %v1012_v39  ;;  %v1203_v13 = vunpack.i.h.bf16 %v1201_v12  ;;  %v1202_v14 = vunpack.i.l.bf16 %v1201_v12 }
 0x27a   : > { %1105 = vmatpush3.bf16.msk.msra.mxu0 %vm1591_vm2, %v1012_v39 }
 0x27b   : > { %v1022_v16 = vpack.c.bf16 %v1203_v13, %v1202_v14 }
 0x283   : > { %v1196_v0 = vpop.permute.xlu0 %1195 }
 0x284   : > { %v1198_v1 = vunpack.i.h.bf16 %v1196_v0  ;;  %v1197_v6 = vunpack.i.l.bf16 %v1196_v0 }
 0x286   : > { %v1017_v9 = vpack.c.bf16 %v1198_v1, %v1197_v6 }
 0x287   : > { %v1206_v15 = vpop.permute.xlu0 %1205 }
 0x288   : > { %1106 = vmatprep.subr.msk.bf16.mxu0 %vm1591_vm2, %v1017_v9  ;;  %v1208_v38 = vunpack.i.h.bf16 %v1206_v15  ;;  %v1207_v17 = vunpack.i.l.bf16 %v1206_v15 }
 0x289   : > { %1107 = vmatpush3.bf16.msk.msra.mxu0 %vm1591_vm2, %v1017_v9  ;;  %v538_v23 = vpop.permute.xlu1 %537 }
 0x28a   : > { %1108 = vmatprep.subr.bf16.mxu0 %v518_v33  ;;  %v1027_v19 = vpack.c.bf16 %v1208_v38, %v1207_v17 }
 0x28d   : > { %1109 = vmatpush3.bf16.msra.mxu0 %v518_v33  ;;  %v546_v24 = vpop.permute.xlu1 %545  ;;  %v1380_v33 = vmov 4  }
 0x28e   : > { %1110 = vmatprep.subr.bf16.mxu0 %v519_v58  ;;  %1211 = vset.pattern.permute.xlu1 %v1380_v33 }
 0x291   : > { %1111 = vmatpush3.bf16.msra.mxu0 %v519_v58  ;;  %v550_v41 = vpop.permute.xlu1 %549 }
 0x292   : > { %1112 = vmatprep.subr.msk.bf16.mxu0 %vm1603_vm4, %v1022_v16 }
 0x295   : > { %1113 = vmatpush3.bf16.msk.msra.mxu0 %vm1603_vm4, %v1022_v16 }
 0x296   : > { %1114 = vmatprep.subr.msk.bf16.mxu0 %vm1603_vm4, %v1027_v19 }
 0x298   : > { %v542_v29 = vpop.permute.xlu0 %541 }
 0x299   : > { %1115 = vmatpush3.bf16.msk.msra.mxu0 %vm1603_vm4, %v1027_v19 }
 0x29c   : > { %1117 = vmatmul.mubr.msk.bf16.vlgmr.msra.gmra.mrb[0].mxu0 %vm562_vm0, %v1244_v21 }
 0x36f   : > { %v1118_v27 = vpop.f32.mrb[0].mxu0 }
 0x370   : > { %v603_v28 = vpop.f32.mrb[1].mxu0  ;;  %v612_v40 = vadd.f32 %v1118_v27, %v546_v24  ;;  %v263_v27 = vld [vmem:[%s1641_s12 + $0x18] sm:$0xff]  ;;  %s1317_s12 = scalar_lea.vmem %s1316_s11, 1024 }
 0x371   : > { %v604_v30 = vadd.f32 %v603_v28, %v538_v23  ;;  %v1119_v31 = vpop.f32.mrb[2].mxu0 }
 0x372   : > { %v606_v34 = vpop.f32.mrb[3].mxu0  ;;  %v615_v32 = vadd.f32 %v1119_v31, %v550_v41 }
 0x373   : > { %v607_v35 = vadd.f32 %v606_v34, %v542_v29  ;;  %618 = vadd.xlane.f32.xlu0 %v604_v30 }
 0x375   : > { %620 = vadd.xlane.f32.xlu1 %v607_v35 }
 0x377   : > { %622 = vadd.xlane.f32.xlu0 %v612_v40 }
 0x37b   : > { %624 = vadd.xlane.f32.xlu0 %v615_v32 }
 0x400   : > { %v619_v42 = vpop.xlane.xlu0 %618 }
 0x401   : > { %v627_v43 = vmul.f32 0.0078125, %v619_v42 }
 0x402   : > { %v621_v50 = vpop.xlane.xlu1 %620 }
 0x403   : > { %v1619_v51 = vsub.f32 %v604_v30, %v627_v43  ;;  %v628_v49 = vmul.f32 0.0078125, %v621_v50 }
 0x404   : > { %v623_v18 = vpop.xlane.xlu0 %622 }
 0x405   : > { %v1621_v20 = vsub.f32 %v607_v35, %v628_v49  ;;  %v629_v52 = vmul.f32 0.0078125, %v623_v18  ;;  %v635_v55 = vmul.f32 %v1619_v51, %v1619_v51 }
 0x407   : > { %v1625_v56 = vsub.f32 %v612_v40, %v629_v52  ;;  %639 = vadd.xlane.f32.xlu1 %v635_v55  ;;  %v636_v25 = vmul.f32 %v1621_v20, %v1621_v20 }
 0x408   : > { %v625_v57 = vpop.xlane.xlu0 %624 }
 0x409   : > { %v630_v26 = vmul.f32 0.0078125, %v625_v57  ;;  %641 = vadd.xlane.f32.xlu0 %v636_v25  ;;  %v637_v58 = vmul.f32 %v1625_v56, %v1625_v56 }
 0x40b   : > { %v1631_v53 = vsub.f32 %v615_v32, %v630_v26  ;;  %643 = vadd.xlane.f32.xlu1 %v637_v58 }
 0x40d   : > { %v638_v54 = vmul.f32 %v1631_v53, %v1631_v53 }
 0x40f   : > { %645 = vadd.xlane.f32.xlu0 %v638_v54 }
 0x41c   : > { %688 = vperm.xlu1 %1211, %v1542_v45  }
 0x420   : > { %692 = vperm.xlu1 %1211, %v1548_v46  }
 0x424   : > { %1212 = vset.pattern.permute.xlu1 %v1376_v47 }
 0x425   : > { %709 = vperm.xlu1 %1212, %v260_v59   ;;  %732 = vperm.xlu0 %1214, %v260_v59  }
 0x429   : > { %714 = vperm.xlu1 %1212, %v261_v60   ;;  %1218 = vset.pattern.permute.xlu0 %v1381_v61 }
 0x42d   : > { %1213 = vset.pattern.permute.xlu1 %v1380_v33 }
 0x42e   : > { %696 = vperm.xlu1 %1213, %v1555_v48  }
 0x432   : > { %700 = vperm.xlu1 %1213, %v1565_v22  }
 0x436   : > { %1215 = vset.pattern.permute.xlu1 %v1375_v44 }
 0x437   : > { %736 = vperm.xlu1 %1215, %v261_v60  }
 0x43b   : > { %1216 = vset.pattern.permute.xlu1 %v1376_v47 }
 0x43c   : > { %719 = vperm.xlu1 %1216, %v262_v62  }
 0x440   : > { %1217 = vset.pattern.permute.xlu1 %v1381_v61 }
 0x494   : > { %v640_v63 = vpop.xlane.xlu1 %639 }
 0x495   : > { %v647_v0 = vmul.f32 0.0078125, %v640_v63 }
 0x496   : > { %v642_v39 = vpop.xlane.xlu0 %641 }
 0x497   : > { %v648_v1 = vmul.f32 0.0078125, %v642_v39  ;;  %v651_v13 = vadd.f32 1e-05, %v647_v0 }
 0x498   : > { %v644_v6 = vpop.xlane.xlu1 %643 }
 0x499   : > { %v652_v9 = vadd.f32 1e-05, %v648_v1  ;;  %v649_v12 = vmul.f32 0.0078125, %v644_v6 }
 0x49b   : > { %1287 = vrsqrt.f32 %v652_v9  ;;  %v653_v14 = vadd.f32 1e-05, %v649_v12 }
 0x49c   : > { %v646_v15 = vpop.xlane.xlu0 %645  ;;  %v689_v31 = vpop.permute.xlu1 %688 }
 0x49d   : > { %1289 = vrsqrt.f32 %v653_v14  ;;  %v650_v16 = vmul.f32 0.0078125, %v646_v15 }
 0x49e   : > { %1291 = vrsqrt.f32 %v651_v13 }
 0x49f   : > { %v654_v38 = vadd.f32 1e-05, %v650_v16 }
 0x4a0   : > { %v693_v34 = vpop.permute.xlu1 %692 }
 0x4a1   : > { %1293 = vrsqrt.f32 %v654_v38 }
 0x4a4   : > { %v710_v35 = vpop.permute.xlu1 %709  ;;  %v733_v42 = vpop.permute.xlu0 %732 }
 0x4a5   : > { %v1288_v17 = vpop.eup %1287 }
 0x4a6   : > { %v660_v19 = vmul.f32 %v1288_v17, %v1548_v46 }
 0x4a7   : > { %v1290_v21 = vpop.eup %1289 }
 0x4a8   : > { %670 = vperm.xlu0 %1218, %v660_v19   ;;  %v661_v23 = vmul.f32 %v1290_v21, %v1555_v48  ;;  %v1292_v24 = vpop.eup %1291  ;;  %v715_v40 = vpop.permute.xlu1 %714 }
 0x4a9   : > { %v659_v28 = vmul.f32 %v1292_v24, %v1542_v45 }
 0x4aa   : > { %675 = vperm.xlu1 %1217, %v661_v23  }
 0x4ab   : > { %v1294_v29 = vpop.eup %1293 }
 0x4ac   : > { %1219 = vset.pattern.permute.xlu0 %v1376_v47  ;;  %v662_v30 = vmul.f32 %v1294_v29, %v1565_v22 }
 0x4ad   : > { %724 = vperm.xlu0 %1219, %v263_v27   ;;  %v697_v41 = vpop.permute.xlu1 %696 }
 0x4ae   : > { %665 = vperm.xlu1 %1217, %v659_v28  }
 0x4b1   : > { %v701_v32 = vpop.permute.xlu1 %700 }
 0x4b2   : > { %680 = vperm.xlu1 %1217, %v662_v30  }
 0x4b6   : > { %1220 = vset.pattern.permute.xlu1 %v1375_v44  ;;  %v737_v33 = vpop.permute.xlu1 %736 }
 0x4b7   : > { %740 = vperm.xlu1 %1220, %v262_v62  }
 0x4bb   : > { %744 = vperm.xlu1 %1220, %v263_v27   ;;  %v720_v43 = vpop.permute.xlu1 %719 }
 0x527   : > { %v671_v47 = vpop.permute.xlu0 %670 }
 0x528   : > { %v684_v50 = vmul.f32 %v671_v47, %v1621_v20 }
 0x529   : > { %v676_v49 = vpop.permute.xlu1 %675 }
 0x52a   : > { %v704_v18 = vadd.f32 %v693_v34, %v684_v50  ;;  %v685_v55 = vmul.f32 %v676_v49, %v1625_v56 }
 0x52c   : > { %v728_v52 = vmul.f32 %v715_v40, %v704_v18  ;;  %v705_v54 = vadd.f32 %v697_v41, %v685_v55  ;;  %v725_v0 = vpop.permute.xlu0 %724 }
 0x52d   : > { %v666_v44 = vpop.permute.xlu1 %665 }
 0x52e   : > { %v748_v25 = vadd.f32 %v737_v33, %v728_v52  ;;  %v683_v57 = vmul.f32 %v666_v44, %v1619_v51  ;;  %v729_v20 = vmul.f32 %v720_v43, %v705_v54  ;;  %v1245_v33 = vld [vmem:[%s1761_s4] sm:$0xff]  }
 0x52f   : > { %1132 = vmatprep.mubr.msk.bf16.mxu1 %vm562_vm0, %v1245_v33 }
 0x530   : > { %v1032_v26 = vmul.f32 -1.442695, %v748_v25  ;;  %v703_v58 = vadd.f32 %v689_v31, %v683_v57 }
 0x531   : > { %v681_v59 = vpop.permute.xlu1 %680 }
 0x532   : > { %1295 = vpow2.f32 %v1032_v26  ;;  %v727_v60 = vmul.f32 %v710_v35, %v703_v58  ;;  %v686_v61 = vmul.f32 %v681_v59, %v1631_v53  ;;  %v311_v59 = vadd.f32 %v1494_v11, %v1488_v8 }
 0x534   : > { %v747_v62 = vadd.f32 %v733_v42, %v727_v60  ;;  %v706_v63 = vadd.f32 %v701_v32, %v686_v61  ;;  %v1382_v42 = vmov 5   ;;  %v309_v61 = vadd.f32 %v1474_v2, %v1476_v3 }
 0x535   : > { %1241 = vset.pattern.permute.xlu0 %v1382_v42  ;;  %1242 = vset.pattern.permute.xlu1 %v1382_v42 }
 0x536   : > { %v1031_v39 = vmul.f32 -1.442695, %v747_v62  ;;  %v741_v1 = vpop.permute.xlu1 %740  ;;  %v730_v56 = vmul.f32 %v725_v0, %v706_v63  ;;  %v313_v0 = vmul.f32 0.5, %v309_v61 }
 0x537   : > { %v749_v6 = vadd.f32 %v741_v1, %v729_v20  ;;  %v315_v20 = vmul.f32 0.5, %v311_v59 }
 0x538   : > { %1297 = vpow2.f32 %v1031_v39 }
 0x539   : > { %v1033_v9 = vmul.f32 -1.442695, %v749_v6 }
 0x53a   : > { %v745_v12 = vpop.permute.xlu1 %744 }
 0x53b   : > { %1299 = vpow2.f32 %v1033_v9  ;;  %v750_v51 = vadd.f32 %v745_v12, %v730_v56 }
 0x53c   : > { %v1296_v13 = vpop.eup %1295 }
 0x53d   : > { %v1034_v14 = vmul.f32 -1.442695, %v750_v51  ;;  %v764_v15 = vadd.f32 1.0, %v1296_v13 }
 0x53f   : > { %1301 = vpow2.f32 %v1034_v14 }
 0x540   : > { %1303 = vrcp.f32 %v764_v15 }
 0x542   : > { %v1298_v16 = vpop.eup %1297 }
 0x543   : > { %v763_v53 = vadd.f32 1.0, %v1298_v16 }
 0x545   : > { %v1300_v38 = vpop.eup %1299  ;;  %1305 = vrcp.f32 %v763_v53 }
 0x546   : > { %v765_v17 = vadd.f32 1.0, %v1300_v38 }
 0x548   : > { %1307 = vrcp.f32 %v765_v17 }
 0x549   : > { %v1302_v19 = vpop.eup %1301 }
 0x54a   : > { %v766_v21 = vadd.f32 1.0, %v1302_v19  ;;  %v1304_v23 = vpop.eup %1303 }
 0x54b   : > { %v776_v28 = vmul.f32 %v1304_v23, %v748_v25 }
 0x54c   : > { %1309 = vrcp.f32 %v766_v21 }
 0x54f   : > { %v1306_v24 = vpop.eup %1305 }
 0x550   : > { %v775_v27 = vmul.f32 %v1306_v24, %v747_v62  ;;  %v312_v62 = vadd.f32 %v1492_v10, %v1486_v7  ;;  %v314_v7 = vmul.f32 0.5, %v310_v36 }
 0x552   : > { %v1221_v29 = vpack.i.bf16 %v776_v28, %v775_v27  ;;  %v793_v30 = vpack.c.bf16 %v776_v28, %v775_v27  ;;  %v1308_v31 = vpop.eup %1307  ;;  %v316_v8 = vmul.f32 0.5, %v312_v62 }
 0x553   : > { %v777_v35 = vmul.f32 %v1308_v31, %v749_v6 }
 0x554   : > { %1222 = vrot.lane.b32.xlu0 %v1221_v29, %s1377_s23 }
 0x556   : > { %v1310_v34 = vpop.eup %1309 }
 0x557   : > { %v778_v40 = vmul.f32 %v1310_v34, %v750_v51 }
 0x558   : > { %1232 = vrot.lane.b32.xlu0 %v1221_v29, %s1378_s25 }
 0x559   : > { %v1226_v41 = vpack.i.bf16 %v778_v40, %v777_v35  ;;  %v794_v32 = vpack.c.bf16 %v778_v40, %v777_v35 }
 0x55b   : > { %1227 = vrot.lane.b32.xlu1 %v1226_v41, %s1377_s23  ;;  %s912_s23 = sshll.u32 %s232_s17, 4  ;;  %s1707_s23 = int_to_ptr.vmem [resolvable:$true] %s912_s23 }
 0x55c   : > { %810 = vperm.xlu0 %1241, %v1542_v45   ;;  %s1311_s9 = scalar_lea.vmem %s1707_s23, 512  ;;  %p1318_p0 = scmp.lt.s32.totalorder %s1707_s23, %s1316_s11 }
 0x55d   : > { %p1312_p11 = scmp.ne.s32.totalorder %s1707_s23, %s1311_s9  ;;  %p1319_p1 = scmp.lt.s32.totalorder %s1317_s12, %s1311_s9 }
 0x55f   : > { %1237 = vrot.lane.b32.xlu1 %v1226_v41, %s1378_s25  ;;  %s1066_s25 = sshll.u32 %s1437_s22, 9  ;;  %s1716_s22 = scalar_lea.sflag [#allocation3], %s230_s15 }
 0x560   : > { %822 = vperm.xlu0 %1241, %v1565_v22   ;;  %s1712_s8 = scalar_lea.hbm %s1762_s5, %s1066_s25  ;;  %p1313_p12 = pnand %p1312_p11, %p1454_p5 }
 0x561   : > { %p1320_p2 = por %p1319_p1, %p1318_p0 }
 0x562   : > { %p1314_p13 = pneg %p1313_p12 }
 0x563   : > { %814 = vperm.xlu1 %1242, %v1548_v46  }
 0x564   : > { %p1321_p3 = pnand %p1320_p2, %p1314_p13 }
 0x567   : > { %818 = vperm.xlu1 %1242, %v1555_v48  }
 0x5c6   : > { %v1223_v43 = vpop.permute.xlu0 %1222 }
 0x5c7   : > { %v1225_v47 = vunpack.i.h.bf16 %v1223_v43  ;;  %v1224_v50 = vunpack.i.l.bf16 %v1223_v43 }
 0x5c9   : > { %v1040_v49 = vpack.c.bf16 %v1225_v47, %v1224_v50 }
 0x5ca   : > { %v1233_v46 = vpop.permute.xlu0 %1232 }
 0x5cb   : > { %1120 = vmatprep.subr.msk.bf16.mxu1 %vm1591_vm2, %v1040_v49  ;;  %v1235_v48 = vunpack.i.h.bf16 %v1233_v46  ;;  %v1234_v22 = vunpack.i.l.bf16 %v1233_v46 }
 0x5cc   : > { %1121 = vmatpush3.bf16.msk.msra.mxu1 %vm1591_vm2, %v1040_v49 }
 0x5cd   : > { %v1228_v18 = vpop.permute.xlu1 %1227  ;;  %v1050_v25 = vpack.c.bf16 %v1235_v48, %v1234_v22 }
 0x5ce   : > { %v1230_v52 = vunpack.i.h.bf16 %v1228_v18  ;;  %v1229_v55 = vunpack.i.l.bf16 %v1228_v18 }
 0x5d0   : > { %v1045_v45 = vpack.c.bf16 %v1230_v52, %v1229_v55 }
 0x5d1   : > { %v1238_v44 = vpop.permute.xlu1 %1237 }
 0x5d2   : > { %1122 = vmatprep.subr.msk.bf16.mxu1 %vm1591_vm2, %v1045_v45  ;;  %v1240_v57 = vunpack.i.h.bf16 %v1238_v44  ;;  %v1239_v26 = vunpack.i.l.bf16 %v1238_v44 }
 0x5d3   : > { %1123 = vmatpush3.bf16.msk.msra.mxu1 %vm1591_vm2, %v1045_v45 }
 0x5d4   : > { %1124 = vmatprep.subr.bf16.mxu1 %v793_v30  ;;  %v1055_v58 = vpack.c.bf16 %v1240_v57, %v1239_v26 }
 0x5d7   : > { %1125 = vmatpush3.bf16.msra.mxu1 %v793_v30 }
 0x5d8   : > { %1126 = vmatprep.subr.bf16.mxu1 %v794_v32 }
 0x5db   : > { %1127 = vmatpush3.bf16.msra.mxu1 %v794_v32  ;;  %v811_v60 = vpop.permute.xlu0 %810 }
 0x5dc   : > { %1128 = vmatprep.subr.msk.bf16.mxu1 %vm1603_vm4, %v1050_v25 }
 0x5df   : > { %1129 = vmatpush3.bf16.msk.msra.mxu1 %vm1603_vm4, %v1050_v25  ;;  %v823_v11 = vpop.permute.xlu0 %822 }
 0x5e0   : > { %1130 = vmatprep.subr.msk.bf16.mxu1 %vm1603_vm4, %v1055_v58 }
 0x5e2   : > { %v815_v54 = vpop.permute.xlu1 %814 }
 0x5e3   : > { %1131 = vmatpush3.bf16.msk.msra.mxu1 %vm1603_vm4, %v1055_v58 }
 0x5e6   : > { %1133 = vmatmul.mubr.msk.bf16.vlgmr.msra.gmra.mrb[0].mxu1 %vm562_vm0, %v1246_v37  ;;  %v819_v63 = vpop.permute.xlu1 %818 }
 0x6b9   : > { %v1134_v39 = vpop.f32.mrb[0].mxu1 }
 0x6ba   : > { %v884_v1 = vadd.f32 %v1134_v39, %v819_v63  ;;  %v875_v6 = vpop.f32.mrb[1].mxu1 }
 0x6bb   : > { %v876_v2 = vadd.f32 %v875_v6, %v811_v60  ;;  %v1135_v3 = vpop.f32.mrb[2].mxu1 }
 0x6bc   : > { %v892_v10 = vadd.f32 %v884_v1, %v315_v20  ;;  %v887_v56 = vadd.f32 %v1135_v3, %v823_v11  ;;  %v878_v9 = vpop.f32.mrb[3].mxu1 }
 0x6bd   : > { %v890_v4 = vadd.f32 %v876_v2, %v313_v0  ;;  %v879_v5 = vadd.f32 %v878_v9, %v815_v54 }
 0x6be   : > { %896 = vst [vmem:[%s232_s17 + $0x10] sm:$0xff] %v892_v10  ;;  %v893_v12 = vadd.f32 %v887_v56, %v316_v8 }
 0x6bf   : > { %894 = vst [vmem:[%s232_s17] sm:$0xff] %v890_v4  ;;  %v891_v51 = vadd.f32 %v879_v5, %v314_v7 }
 0x6c0   : > { %897 = vst [vmem:[%s232_s17 + $0x18] sm:$0xff] %v893_v12 }
 0x6c1   : > { %895 = vst [vmem:[%s232_s17 + $0x8] sm:$0xff] %v891_v51 }
 0x6c2   : > { %1324 = shalt.err (!%p1321_p3)
}
 0x6c3   : > { %s1325_s30 = scalar_lea.hbm %s1712_s8, 512  ;;  %s1329_s14 = scalar_lea.hbm %s1762_s5, 1024 }
 0x6c4   : > { %p1326_p4 = scmp.ne.s32.totalorder %s1712_s8, %s1325_s30  ;;  %p1330_p9 = scmp.lt.u32.totalorder %s1712_s8, %s1762_s5 }
 0x6c5   : > { %p1331_p10 = scmp.lt.u32.totalorder %s1329_s14, %s1325_s30  ;;  %p1333_p12 = scmp.lt.u32.totalorder %s1325_s30, %s1712_s8 }
 0x6c6   : > { %p1327_p7 = pnand %p1326_p4, %p1454_p5 }
 0x6c7   : > { %p1332_p11 = por %p1331_p10, %p1330_p9 }
 0x6c8   : > { %p1328_p8 = pneg %p1327_p7 }
 0x6c9   : > { %p1334_p13 = por %p1333_p12, %p1332_p11 }
 0x6cb   : > { %p1335_p0 = pnand %p1334_p13, %p1328_p8 }
 0x6cd   : > { %1338 = shalt.err (!%p1335_p0)
}
 0x6ce   : > { %s1384_s17 = smov 128   ;;  %s1385_s25 = smov 8  }
 0x6cf   : > { %1136 = dma.vmem_to_hbm [thread:$0]  (%p1454_p5), %s1707_s23, 512, %s1712_s8, %s1716_s22, %s1384_s17, %s1384_s17, %s1385_s25  }
 0x6d0 PF: > { %p1142_p1 = scmp.ge.s32.totalorder %s1373_s21, 2  ;;  %s927_s26 = sand.u32 1, %s1361_s18  }
 0x6d1   : > { %s928_s7 = scalar_lea.sflag [#allocation3], %s927_s26 }
 0x6d2   : > { %p1139_p2 = pnand %p1142_p1, %p1458_p6 }
 0x6d4   : > { %1356 = dma.done.wait (!%p1139_p2), %s928_s7, 512  }
 0x6d5   : > { %1358 = vsyncadd (!%p1139_p2), %s928_s7, 4294966784  ;;  %p15_p3 = scmp.ge.s32.totalorder %s1441_s24, 4   ;;  %s1769_s18 = smov %s1365_s19 }
 0x6d6   : > { %s1770_s19 = smov %s1369_s20  ;;  %s1771_s20 = smov %s1452_s27 }
 0x6d7   : > { %s1772_s21 = smov %s1441_s24  ;;  %17 = sbr.rel (!%p15_p3) target bundleno = 3 (0x3), region = 79 }
 0x6de   :  { %933 = vsyncpa [#allocation3], 1 }
 0x6df   :  { %935 = vsyncpa [#allocation3 + $0x1], 1 }

</bundles_post_ra>
